<compile_context>
chip_gen: v6e
topology: v6e:2x2x1
jax: 0.10.0
libtpu: 0.0.40
codegen_flags: <defaults>
</compile_context>

<pallas_src>
import functools

import jax
import jax.numpy as jnp
from jax.experimental import pallas as pl
from jax.experimental.pallas import tpu as pltpu


# ---------------------------------------------------------------------------
# Fused kernel
# ---------------------------------------------------------------------------
def _dual_stream_down_kernel(x1_ref, x2_ref, wcs_ref, w1_ref, sb1_ref,
                             w2_ref, sb2_ref, o_ref, xpad_ref, hpad_ref):
    """maxpool2x2 + cross-stitch + (conv3x3 -> BN -> ReLU) x2, both streams.

    x1_ref/x2_ref : (1, H, W/2, 2*Cin)  horizontal pool pair folded into channels
    wcs_ref       : (2, Cin)            cross-stitch per-channel blend weights
    w1_ref        : (9*Cin, 2*Cmid)     conv1 of both streams, concat on Cout
    sb1_ref       : (2, 2*Cmid)         folded BN scale / bias (f32)
    w2_ref        : (9*2*Cmid, 2*Cout)  conv2 of both streams, block-diagonal
    sb2_ref       : (2, 2*Cout)
    o_ref         : (1, Hp, Wp, 2*Cout)
    xpad_ref      : VMEM (Hp+2, Wp+2, Cin)     zero-padded stitched x
    hpad_ref      : VMEM (Hp+2, Wp+2, 2*Cmid)  zero-padded hidden h
    """
    cdtype = xpad_ref.dtype
    Hp2, Wp2, Cin = xpad_ref.shape
    Hp, Wp = Hp2 - 2, Wp2 - 2
    HW = Hp * Wp
    Cmid2 = hpad_ref.shape[-1]
    Cout2 = o_ref.shape[-1]

    # Halo borders only need zeroing once per pallas_call; the interiors are
    # fully overwritten every grid step.
    @pl.when(pl.program_id(0) == 0)
    def _():
        xpad_ref[...] = jnp.zeros_like(xpad_ref)
        hpad_ref[...] = jnp.zeros_like(hpad_ref)

    def pool2x2(ref):
        # (1, 2*Hp, Wp, 2*Cin): channels [0:Cin] = even column, [Cin:] = odd column.
        x = ref[0]
        h = jnp.maximum(x[:, :, :Cin], x[:, :, Cin:])   # horizontal max (2*Hp, Wp, Cin)
        h = h.reshape(Hp, 2, Wp, Cin)                   # leading-dim split (free)
        return jnp.maximum(h[:, 0], h[:, 1])            # vertical max   (Hp, Wp, Cin)

    # --- 2x2 max-pool on both streams + per-channel cross-stitch blend -------
    x = wcs_ref[0] * pool2x2(x1_ref) + wcs_ref[1] * pool2x2(x2_ref)

    # --- 3x3 conv as ONE matmul over in-kernel taps, folded BN + ReLU --------
    def conv3x3_bn_relu(src, pad_ref, w_ref, sb_ref, cin):
        pad_ref[pl.ds(1, Hp), pl.ds(1, Wp), :] = src.astype(cdtype)
        xp = pad_ref[...]
        taps = [xp[kh:kh + Hp, kw:kw + Wp, :]
                for kh in range(3) for kw in range(3)]   # 9 x (Hp, Wp, cin)
        xs = jnp.concatenate(taps, axis=-1).reshape(HW, 9 * cin)
        acc = jnp.dot(xs, w_ref[...], preferred_element_type=jnp.float32)
        return jnp.maximum(acc * sb_ref[0] + sb_ref[1], 0.0)

    h = conv3x3_bn_relu(x, xpad_ref, w1_ref, sb1_ref, Cin)           # (HW, 2*Cmid) f32
    y = conv3x3_bn_relu(h.reshape(Hp, Wp, Cmid2), hpad_ref,
                        w2_ref, sb2_ref, Cmid2)                      # (HW, 2*Cout) f32

    o_ref[...] = y.reshape(1, Hp, Wp, Cout2).astype(o_ref.dtype)


# ---------------------------------------------------------------------------
# Wrapper
# ---------------------------------------------------------------------------
def dual_stream_down(x1_nchw, x2_nchw, fused_params, *, compute_dtype=jnp.bfloat16):
    """Returns (y1, y2) in NCHW, matching DualStreamDown.forward semantics."""
    N, Cin, H, W = x1_nchw.shape
    Hp, Wp = H // 2, W // 2
    cd = compute_dtype

    # NCHW -> NHWC, then a FREE row-major reshape folding the horizontal pool
    # pair into the channel axis (no extra materialized copy, unlike the old
    # window_split transpose).
    def prep(x):
        return jnp.transpose(x, (0, 2, 3, 1)).reshape(N, H, Wp, 2 * Cin).astype(cd)

    x1 = prep(x1_nchw)
    x2 = prep(x2_nchw)

    wcs = fused_params["cross_stitch"].astype(cd)
    w1, sb1 = fused_params["conv1_fused"]
    w2, sb2 = fused_params["conv2_fused"]
    w1 = w1.astype(cd)
    w2 = w2.astype(cd)
    Cmid2 = sb1.shape[-1]
    Cout2 = sb2.shape[-1]
    Cout = Cout2 // 2

    out = pl.pallas_call(
        _dual_stream_down_kernel,
        out_shape=jax.ShapeDtypeStruct((N, Hp, Wp, Cout2), jnp.float32),
        grid=(N,),
        in_specs=[
            pl.BlockSpec((1, H, Wp, 2 * Cin), lambda n: (n, 0, 0, 0)),
            pl.BlockSpec((1, H, Wp, 2 * Cin), lambda n: (n, 0, 0, 0)),
            pl.BlockSpec((2, Cin), lambda n: (0, 0)),
            pl.BlockSpec((9 * Cin, Cmid2), lambda n: (0, 0)),
            pl.BlockSpec((2, Cmid2), lambda n: (0, 0)),
            pl.BlockSpec((9 * Cmid2, Cout2), lambda n: (0, 0)),
            pl.BlockSpec((2, Cout2), lambda n: (0, 0)),
        ],
        out_specs=pl.BlockSpec((1, Hp, Wp, Cout2), lambda n: (n, 0, 0, 0)),
        scratch_shapes=[
            pltpu.VMEM((Hp + 2, Wp + 2, Cin), cd),
            pltpu.VMEM((Hp + 2, Wp + 2, Cmid2), cd),
        ],
        compiler_params=pltpu.CompilerParams(dimension_semantics=("parallel",)),
    )(x1, x2, wcs, w1, sb1, w2, sb2)

    y = jnp.transpose(out, (0, 3, 1, 2))       # NHWC -> NCHW, channels = [s1 | s2]
    return y[:, :Cout], y[:, Cout:]


# ---------------------------------------------------------------------------
# Parameters (deterministic synthetic init; Conv bias + BN folded to scale/bias)
# ---------------------------------------------------------------------------
def make_conv_bn(key, cin, cout, eps=1e-5):
    k1, k2, k3, k4, k5, k6 = jax.random.split(key, 6)
    w = 0.1 * jax.random.normal(k1, (9, cin, cout), jnp.float32)
    b = 0.1 * jax.random.normal(k2, (cout,), jnp.float32)
    gamma = 1.0 + 0.1 * jax.random.normal(k3, (cout,), jnp.float32)
    beta = 0.1 * jax.random.normal(k4, (cout,), jnp.float32)
    mean = 0.1 * jax.random.normal(k5, (cout,), jnp.float32)
    var = 1.0 + 0.1 * jnp.abs(jax.random.normal(k6, (cout,), jnp.float32))
    scale = gamma / jnp.sqrt(var + eps)
    bias = (b - mean) * scale + beta
    return w, jnp.stack([scale, bias]).astype(jnp.float32)


def init_params(key, in_channels, out_channels):
    mid = out_channels
    ks = jax.random.split(key, 4)
    return {
        "cross_stitch": jnp.full((2, in_channels), 0.5, jnp.float32),
        "s1_conv1": make_conv_bn(ks[0], in_channels, mid),
        "s1_conv2": make_conv_bn(ks[1], mid, out_channels),
        "s2_conv1": make_conv_bn(ks[2], in_channels, mid),
        "s2_conv2": make_conv_bn(ks[3], mid, out_channels),
    }


def fuse_params(params):
    """Fuse both streams for the single-kernel forward.

    conv1: both streams read the same stitched x -> concat weights along Cout.
    conv2: stream-private inputs (h1 | h2)       -> block-diagonal on (Cin, Cout).
    """
    w1a, sb1a = params["s1_conv1"]
    w1b, sb1b = params["s2_conv1"]
    w2a, sb2a = params["s1_conv2"]
    w2b, sb2b = params["s2_conv2"]
    k, cin, cmid = w1a.shape
    cout = w2a.shape[-1]

    w1 = jnp.concatenate([w1a, w1b], axis=-1).reshape(k * cin, 2 * cmid)
    sb1 = jnp.concatenate([sb1a, sb1b], axis=-1)

    z = jnp.zeros((k, cmid, cout), w2a.dtype)
    w2 = jnp.concatenate(
        [jnp.concatenate([w2a, z], axis=-1),    # h1 channels -> stream-1 outputs
         jnp.concatenate([z, w2b], axis=-1)],   # h2 channels -> stream-2 outputs
        axis=1).reshape(k * 2 * cmid, 2 * cout)
    sb2 = jnp.concatenate([sb2a, sb2b], axis=-1)

    return {
        "cross_stitch": params["cross_stitch"],
        "conv1_fused": (w1, sb1),
        "conv2_fused": (w2, sb2),
    }


# ---------------------------------------------------------------------------
# Pure-JAX reference (unfused) for correctness checks
# ---------------------------------------------------------------------------
def _ref_conv_bn_relu(x, w9, sb):
    cin, cout = w9.shape[1], w9.shape[2]
    w_hwio = w9.reshape(3, 3, cin, cout)
    y = jax.lax.conv_general_dilated(
        x, w_hwio, (1, 1), "SAME", dimension_numbers=("NHWC", "HWIO", "NHWC"))
    return jnp.maximum(y * sb[0] + sb[1], 0.0)


def _ref_forward(x1_nchw, x2_nchw, params):
    x1 = jnp.transpose(x1_nchw, (0, 2, 3, 1))
    x2 = jnp.transpose(x2_nchw, (0, 2, 3, 1))
    N, H, W, C = x1.shape

    def pool(x):
        return x.reshape(N, H // 2, 2, W // 2, 2, C).max(axis=(2, 4))

    w_cs = params["cross_stitch"]
    x = w_cs[0] * pool(x1) + w_cs[1] * pool(x2)
    y1 = _ref_conv_bn_relu(_ref_conv_bn_relu(x, *params["s1_conv1"]), *params["s1_conv2"])
    y2 = _ref_conv_bn_relu(_ref_conv_bn_relu(x, *params["s2_conv1"]), *params["s2_conv2"])
    return jnp.transpose(y1, (0, 3, 1, 2)), jnp.transpose(y2, (0, 3, 1, 2))


# ---------------------------------------------------------------------------
if __name__ == "__main__":
    key = jax.random.PRNGKey(0)
    k_x1, k_x2, k_p = jax.random.split(key, 3)

    N, Cin, H, W = 2, 4, 16, 16
    Cout = 8
    x1 = jax.random.normal(k_x1, (N, Cin, H, W), jnp.float32)
    x2 = jax.random.normal(k_x2, (N, Cin, H, W), jnp.float32)
    params = init_params(k_p, Cin, Cout)
    fused = fuse_params(params)

    r1, r2 = _ref_forward(x1, x2, params)

    # f32 compute path: tight check against the reference.
    fwd_f32 = jax.jit(functools.partial(dual_stream_down, compute_dtype=jnp.float32))
    y1, y2 = fwd_f32(x1, x2, fused)
    jax.block_until_ready((y1, y2))
    assert y1.shape == (N, Cout, H // 2, W // 2) and y2.shape == (N, Cout, H // 2, W // 2)
    assert jnp.allclose(y1, r1, atol=1e-4, rtol=1e-4)
    assert jnp.allclose(y2, r2, atol=1e-4, rtol=1e-4)

    # bf16 compute path (recommended on v6e / v7x): f32 accumulation, loose check.
    fwd_bf16 = jax.jit(functools.partial(dual_stream_down, compute_dtype=jnp.bfloat16))
    z1, z2 = fwd_bf16(x1, x2, fused)
    jax.block_until_ready((z1, z2))
    assert jnp.allclose(z1, r1, atol=1e-1, rtol=1e-1)
    assert jnp.allclose(z2, r2, atol=1e-1, rtol=1e-1)

    print("KERNEL_OK")
</pallas_src>

<mosaic_0001>
module attributes {stable_mosaic.version = 11 : i64} {
  func.func @_dual_stream_down_kernel(%arg0: i32, %arg1: memref<1x16x8x8xf32, #tpu.memory_space<vmem>>, %arg2: memref<1x16x8x8xf32, #tpu.memory_space<vmem>>, %arg3: memref<2x4xf32, #tpu.memory_space<vmem>>, %arg4: memref<36x16xf32, #tpu.memory_space<vmem>>, %arg5: memref<2x16xf32, #tpu.memory_space<vmem>>, %arg6: memref<144x16xf32, #tpu.memory_space<vmem>>, %arg7: memref<2x16xf32, #tpu.memory_space<vmem>>, %arg8: memref<1x8x8x16xf32, #tpu.memory_space<vmem>>, %arg9: memref<10x10x4xf32, #tpu.memory_space<vmem>>, %arg10: memref<10x10x16xf32, #tpu.memory_space<vmem>>) attributes {dimension_semantics = [#tpu.dimension_semantics<parallel>], iteration_bounds = array<i64: 2>, scalar_prefetch = 0 : i64, scratch_operands = 2 : i64, tpu.core_type = #tpu.core_type<tc>, window_params = [{transform_indices = @transform_0, window_bounds = array<i64: 1, 16, 8, 8>}, {transform_indices = @transform_1, window_bounds = array<i64: 1, 16, 8, 8>}, {pipeline_mode = #tpu.pipeline_mode<synchronous>, transform_indices = @transform_2, window_bounds = array<i64: 2, 4>}, {pipeline_mode = #tpu.pipeline_mode<synchronous>, transform_indices = @transform_3, window_bounds = array<i64: 36, 16>}, {pipeline_mode = #tpu.pipeline_mode<synchronous>, transform_indices = @transform_4, window_bounds = array<i64: 2, 16>}, {pipeline_mode = #tpu.pipeline_mode<synchronous>, transform_indices = @transform_5, window_bounds = array<i64: 144, 16>}, {pipeline_mode = #tpu.pipeline_mode<synchronous>, transform_indices = @transform_6, window_bounds = array<i64: 2, 16>}, {transform_indices = @transform_7, window_bounds = array<i64: 1, 8, 8, 16>}]} {
    %c0_i32 = arith.constant 0 : i32
    %0 = arith.cmpi eq, %arg0, %c0_i32 : i32
    %1 = arith.extui %0 : i1 to i32
    %c0_i32_0 = arith.constant 0 : i32
    %2 = arith.cmpi ne, %1, %c0_i32_0 : i32
    scf.if %2 {
      %cst_42 = arith.constant 0.000000e+00 : f32
      %93 = vector.broadcast %cst_42 : f32 to vector<10x10x4xf32>
      %c0_43 = arith.constant 0 : index
      %c0_44 = arith.constant 0 : index
      %c0_45 = arith.constant 0 : index
      %94 = vector.load %arg9[%c0_43, %c0_44, %c0_45] : memref<10x10x4xf32, #tpu.memory_space<vmem>>, vector<10x10x4xf32>
      tpu.vector_store %arg9[%c0_43, %c0_44, %c0_45], %93 {strides = array<i32>} : memref<10x10x4xf32, #tpu.memory_space<vmem>>, vector<10x10x4xf32>,
      %cst_46 = arith.constant 0.000000e+00 : f32
      %95 = vector.broadcast %cst_46 : f32 to vector<10x10x16xf32>
      %c0_47 = arith.constant 0 : index
      %c0_48 = arith.constant 0 : index
      %c0_49 = arith.constant 0 : index
      %96 = vector.load %arg10[%c0_47, %c0_48, %c0_49] : memref<10x10x16xf32, #tpu.memory_space<vmem>>, vector<10x10x16xf32>
      tpu.vector_store %arg10[%c0_47, %c0_48, %c0_49], %95 {strides = array<i32>} : memref<10x10x16xf32, #tpu.memory_space<vmem>>, vector<10x10x16xf32>,
    } else {
    }
    %c0 = arith.constant 0 : index
    %c0_1 = arith.constant 0 : index
    %3 = vector.load %arg3[%c0, %c0_1] : memref<2x4xf32, #tpu.memory_space<vmem>>, vector<1x4xf32>
    %4 = vector.shape_cast %3 : vector<1x4xf32> to vector<4xf32>
    %c0_2 = arith.constant 0 : index
    %c0_3 = arith.constant 0 : index
    %c0_4 = arith.constant 0 : index
    %c0_5 = arith.constant 0 : index
    %5 = vector.load %arg1[%c0_2, %c0_3, %c0_4, %c0_5] : memref<1x16x8x8xf32, #tpu.memory_space<vmem>>, vector<1x16x8x8xf32>
    %6 = vector.shape_cast %5 : vector<1x16x8x8xf32> to vector<16x8x8xf32>
    %7 = vector.extract_strided_slice %6 {offsets = [0, 0, 0], sizes = [16, 8, 4], strides = [1, 1, 1]} : vector<16x8x8xf32> to vector<16x8x4xf32>
    %8 = vector.extract_strided_slice %6 {offsets = [0, 0, 4], sizes = [16, 8, 4], strides = [1, 1, 1]} : vector<16x8x8xf32> to vector<16x8x4xf32>
    %9 = arith.maximumf %7, %8 : vector<16x8x4xf32>
    %10 = vector.shape_cast %9 : vector<16x8x4xf32> to vector<8x2x8x4xf32>
    %11 = vector.extract_strided_slice %10 {offsets = [0, 0, 0, 0], sizes = [8, 1, 8, 4], strides = [1, 1, 1, 1]} : vector<8x2x8x4xf32> to vector<8x1x8x4xf32>
    %12 = vector.shape_cast %11 : vector<8x1x8x4xf32> to vector<8x8x4xf32>
    %13 = vector.extract_strided_slice %10 {offsets = [0, 1, 0, 0], sizes = [8, 1, 8, 4], strides = [1, 1, 1, 1]} : vector<8x2x8x4xf32> to vector<8x1x8x4xf32>
    %14 = vector.shape_cast %13 : vector<8x1x8x4xf32> to vector<8x8x4xf32>
    %15 = arith.maximumf %12, %14 : vector<8x8x4xf32>
    %16 = vector.shape_cast %4 : vector<4xf32> to vector<1x1x4xf32>
    %17 = vector.broadcast %16 : vector<1x1x4xf32> to vector<8x8x4xf32>
    %18 = arith.mulf %17, %15 : vector<8x8x4xf32>
    %c1 = arith.constant 1 : index
    %c0_6 = arith.constant 0 : index
    %19 = vector.load %arg3[%c1, %c0_6] : memref<2x4xf32, #tpu.memory_space<vmem>>, vector<1x4xf32>
    %20 = vector.shape_cast %19 : vector<1x4xf32> to vector<4xf32>
    %c0_7 = arith.constant 0 : index
    %c0_8 = arith.constant 0 : index
    %c0_9 = arith.constant 0 : index
    %c0_10 = arith.constant 0 : index
    %21 = vector.load %arg2[%c0_7, %c0_8, %c0_9, %c0_10] : memref<1x16x8x8xf32, #tpu.memory_space<vmem>>, vector<1x16x8x8xf32>
    %22 = vector.shape_cast %21 : vector<1x16x8x8xf32> to vector<16x8x8xf32>
    %23 = vector.extract_strided_slice %22 {offsets = [0, 0, 0], sizes = [16, 8, 4], strides = [1, 1, 1]} : vector<16x8x8xf32> to vector<16x8x4xf32>
    %24 = vector.extract_strided_slice %22 {offsets = [0, 0, 4], sizes = [16, 8, 4], strides = [1, 1, 1]} : vector<16x8x8xf32> to vector<16x8x4xf32>
    %25 = arith.maximumf %23, %24 : vector<16x8x4xf32>
    %26 = vector.shape_cast %25 : vector<16x8x4xf32> to vector<8x2x8x4xf32>
    %27 = vector.extract_strided_slice %26 {offsets = [0, 0, 0, 0], sizes = [8, 1, 8, 4], strides = [1, 1, 1, 1]} : vector<8x2x8x4xf32> to vector<8x1x8x4xf32>
    %28 = vector.shape_cast %27 : vector<8x1x8x4xf32> to vector<8x8x4xf32>
    %29 = vector.extract_strided_slice %26 {offsets = [0, 1, 0, 0], sizes = [8, 1, 8, 4], strides = [1, 1, 1, 1]} : vector<8x2x8x4xf32> to vector<8x1x8x4xf32>
    %30 = vector.shape_cast %29 : vector<8x1x8x4xf32> to vector<8x8x4xf32>
    %31 = arith.maximumf %28, %30 : vector<8x8x4xf32>
    %32 = vector.shape_cast %20 : vector<4xf32> to vector<1x1x4xf32>
    %33 = vector.broadcast %32 : vector<1x1x4xf32> to vector<8x8x4xf32>
    %34 = arith.mulf %33, %31 : vector<8x8x4xf32>
    %35 = arith.addf %18, %34 : vector<8x8x4xf32>
    %c1_11 = arith.constant 1 : index
    %c1_12 = arith.constant 1 : index
    %c0_13 = arith.constant 0 : index
    %36 = vector.load %arg9[%c1_11, %c1_12, %c0_13] : memref<10x10x4xf32, #tpu.memory_space<vmem>>, vector<8x8x4xf32>
    tpu.vector_store %arg9[%c1_11, %c1_12, %c0_13], %35 {strides = array<i32>} : memref<10x10x4xf32, #tpu.memory_space<vmem>>, vector<8x8x4xf32>,
    %c0_14 = arith.constant 0 : index
    %c0_15 = arith.constant 0 : index
    %c0_16 = arith.constant 0 : index
    %37 = vector.load %arg9[%c0_14, %c0_15, %c0_16] : memref<10x10x4xf32, #tpu.memory_space<vmem>>, vector<10x10x4xf32>
    %38 = vector.extract_strided_slice %37 {offsets = [0, 0, 0], sizes = [8, 8, 4], strides = [1, 1, 1]} : vector<10x10x4xf32> to vector<8x8x4xf32>
    %39 = vector.extract_strided_slice %37 {offsets = [0, 1, 0], sizes = [8, 8, 4], strides = [1, 1, 1]} : vector<10x10x4xf32> to vector<8x8x4xf32>
    %40 = vector.extract_strided_slice %37 {offsets = [0, 2, 0], sizes = [8, 8, 4], strides = [1, 1, 1]} : vector<10x10x4xf32> to vector<8x8x4xf32>
    %41 = vector.extract_strided_slice %37 {offsets = [1, 0, 0], sizes = [8, 8, 4], strides = [1, 1, 1]} : vector<10x10x4xf32> to vector<8x8x4xf32>
    %42 = vector.extract_strided_slice %37 {offsets = [1, 1, 0], sizes = [8, 8, 4], strides = [1, 1, 1]} : vector<10x10x4xf32> to vector<8x8x4xf32>
    %43 = vector.extract_strided_slice %37 {offsets = [1, 2, 0], sizes = [8, 8, 4], strides = [1, 1, 1]} : vector<10x10x4xf32> to vector<8x8x4xf32>
    %44 = vector.extract_strided_slice %37 {offsets = [2, 0, 0], sizes = [8, 8, 4], strides = [1, 1, 1]} : vector<10x10x4xf32> to vector<8x8x4xf32>
    %45 = vector.extract_strided_slice %37 {offsets = [2, 1, 0], sizes = [8, 8, 4], strides = [1, 1, 1]} : vector<10x10x4xf32> to vector<8x8x4xf32>
    %46 = vector.extract_strided_slice %37 {offsets = [2, 2, 0], sizes = [8, 8, 4], strides = [1, 1, 1]} : vector<10x10x4xf32> to vector<8x8x4xf32>
    %47 = tpu.concatenate %38, %39, %40, %41, %42, %43, %44, %45, %46 in 2 : vector<8x8x4xf32>, vector<8x8x4xf32>, vector<8x8x4xf32>, vector<8x8x4xf32>, vector<8x8x4xf32>, vector<8x8x4xf32>, vector<8x8x4xf32>, vector<8x8x4xf32>, vector<8x8x4xf32> -> vector<8x8x36xf32>
    %48 = vector.shape_cast %47 : vector<8x8x36xf32> to vector<64x36xf32>
    %c0_17 = arith.constant 0 : index
    %c0_18 = arith.constant 0 : index
    %49 = vector.load %arg4[%c0_17, %c0_18] : memref<36x16xf32, #tpu.memory_space<vmem>>, vector<36x16xf32>
    %cst = arith.constant dense<0.000000e+00> : vector<64x16xf32>
    %50 = tpu.matmul %48, %49, %cst {dimension_numbers = #tpu.dot_dimension_numbers<[1], [0], [0], [1], [0, 0, 1, 1], [], []>} : vector<64x36xf32>, vector<36x16xf32>, vector<64x16xf32> -> vector<64x16xf32>
    %c0_19 = arith.constant 0 : index
    %c0_20 = arith.constant 0 : index
    %51 = vector.load %arg5[%c0_19, %c0_20] : memref<2x16xf32, #tpu.memory_space<vmem>>, vector<1x16xf32>
    %52 = vector.shape_cast %51 : vector<1x16xf32> to vector<16xf32>
    %53 = vector.shape_cast %52 : vector<16xf32> to vector<1x16xf32>
    %54 = vector.broadcast %53 : vector<1x16xf32> to vector<64x16xf32>
    %55 = arith.mulf %50, %54 : vector<64x16xf32>
    %c1_21 = arith.constant 1 : index
    %c0_22 = arith.constant 0 : index
    %56 = vector.load %arg5[%c1_21, %c0_22] : memref<2x16xf32, #tpu.memory_space<vmem>>, vector<1x16xf32>
    %57 = vector.shape_cast %56 : vector<1x16xf32> to vector<16xf32>
    %58 = vector.shape_cast %57 : vector<16xf32> to vector<1x16xf32>
    %59 = vector.broadcast %58 : vector<1x16xf32> to vector<64x16xf32>
    %60 = arith.addf %55, %59 : vector<64x16xf32>
    %cst_23 = arith.constant 0.000000e+00 : f32
    %61 = vector.broadcast %cst_23 : f32 to vector<64x16xf32>
    %62 = arith.maximumf %60, %61 : vector<64x16xf32>
    %63 = vector.shape_cast %62 : vector<64x16xf32> to vector<8x8x16xf32>
    %c1_24 = arith.constant 1 : index
    %c1_25 = arith.constant 1 : index
    %c0_26 = arith.constant 0 : index
    %64 = vector.load %arg10[%c1_24, %c1_25, %c0_26] : memref<10x10x16xf32, #tpu.memory_space<vmem>>, vector<8x8x16xf32>
    tpu.vector_store %arg10[%c1_24, %c1_25, %c0_26], %63 {strides = array<i32>} : memref<10x10x16xf32, #tpu.memory_space<vmem>>, vector<8x8x16xf32>,
    %c0_27 = arith.constant 0 : index
    %c0_28 = arith.constant 0 : index
    %c0_29 = arith.constant 0 : index
    %65 = vector.load %arg10[%c0_27, %c0_28, %c0_29] : memref<10x10x16xf32, #tpu.memory_space<vmem>>, vector<10x10x16xf32>
    %66 = vector.extract_strided_slice %65 {offsets = [0, 0, 0], sizes = [8, 8, 16], strides = [1, 1, 1]} : vector<10x10x16xf32> to vector<8x8x16xf32>
    %67 = vector.extract_strided_slice %65 {offsets = [0, 1, 0], sizes = [8, 8, 16], strides = [1, 1, 1]} : vector<10x10x16xf32> to vector<8x8x16xf32>
    %68 = vector.extract_strided_slice %65 {offsets = [0, 2, 0], sizes = [8, 8, 16], strides = [1, 1, 1]} : vector<10x10x16xf32> to vector<8x8x16xf32>
    %69 = vector.extract_strided_slice %65 {offsets = [1, 0, 0], sizes = [8, 8, 16], strides = [1, 1, 1]} : vector<10x10x16xf32> to vector<8x8x16xf32>
    %70 = vector.extract_strided_slice %65 {offsets = [1, 1, 0], sizes = [8, 8, 16], strides = [1, 1, 1]} : vector<10x10x16xf32> to vector<8x8x16xf32>
    %71 = vector.extract_strided_slice %65 {offsets = [1, 2, 0], sizes = [8, 8, 16], strides = [1, 1, 1]} : vector<10x10x16xf32> to vector<8x8x16xf32>
    %72 = vector.extract_strided_slice %65 {offsets = [2, 0, 0], sizes = [8, 8, 16], strides = [1, 1, 1]} : vector<10x10x16xf32> to vector<8x8x16xf32>
    %73 = vector.extract_strided_slice %65 {offsets = [2, 1, 0], sizes = [8, 8, 16], strides = [1, 1, 1]} : vector<10x10x16xf32> to vector<8x8x16xf32>
    %74 = vector.extract_strided_slice %65 {offsets = [2, 2, 0], sizes = [8, 8, 16], strides = [1, 1, 1]} : vector<10x10x16xf32> to vector<8x8x16xf32>
    %75 = tpu.concatenate %66, %67, %68, %69, %70, %71, %72, %73, %74 in 2 : vector<8x8x16xf32>, vector<8x8x16xf32>, vector<8x8x16xf32>, vector<8x8x16xf32>, vector<8x8x16xf32>, vector<8x8x16xf32>, vector<8x8x16xf32>, vector<8x8x16xf32>, vector<8x8x16xf32> -> vector<8x8x144xf32>
    %76 = vector.shape_cast %75 : vector<8x8x144xf32> to vector<64x144xf32>
    %c0_30 = arith.constant 0 : index
    %c0_31 = arith.constant 0 : index
    %77 = vector.load %arg6[%c0_30, %c0_31] : memref<144x16xf32, #tpu.memory_space<vmem>>, vector<144x16xf32>
    %cst_32 = arith.constant dense<0.000000e+00> : vector<64x16xf32>
    %78 = tpu.matmul %76, %77, %cst_32 {dimension_numbers = #tpu.dot_dimension_numbers<[1], [0], [0], [1], [0, 0, 1, 1], [], []>} : vector<64x144xf32>, vector<144x16xf32>, vector<64x16xf32> -> vector<64x16xf32>
    %c0_33 = arith.constant 0 : index
    %c0_34 = arith.constant 0 : index
    %79 = vector.load %arg7[%c0_33, %c0_34] : memref<2x16xf32, #tpu.memory_space<vmem>>, vector<1x16xf32>
    %80 = vector.shape_cast %79 : vector<1x16xf32> to vector<16xf32>
    %81 = vector.shape_cast %80 : vector<16xf32> to vector<1x16xf32>
    %82 = vector.broadcast %81 : vector<1x16xf32> to vector<64x16xf32>
    %83 = arith.mulf %78, %82 : vector<64x16xf32>
    %c1_35 = arith.constant 1 : index
    %c0_36 = arith.constant 0 : index
    %84 = vector.load %arg7[%c1_35, %c0_36] : memref<2x16xf32, #tpu.memory_space<vmem>>, vector<1x16xf32>
    %85 = vector.shape_cast %84 : vector<1x16xf32> to vector<16xf32>
    %86 = vector.shape_cast %85 : vector<16xf32> to vector<1x16xf32>
    %87 = vector.broadcast %86 : vector<1x16xf32> to vector<64x16xf32>
    %88 = arith.addf %83, %87 : vector<64x16xf32>
    %cst_37 = arith.constant 0.000000e+00 : f32
    %89 = vector.broadcast %cst_37 : f32 to vector<64x16xf32>
    %90 = arith.maximumf %88, %89 : vector<64x16xf32>
    %91 = vector.shape_cast %90 : vector<64x16xf32> to vector<1x8x8x16xf32>
    %c0_38 = arith.constant 0 : index
    %c0_39 = arith.constant 0 : index
    %c0_40 = arith.constant 0 : index
    %c0_41 = arith.constant 0 : index
    %92 = vector.load %arg8[%c0_38, %c0_39, %c0_40, %c0_41] : memref<1x8x8x16xf32, #tpu.memory_space<vmem>>, vector<1x8x8x16xf32>
    tpu.vector_store %arg8[%c0_38, %c0_39, %c0_40, %c0_41], %91 {strides = array<i32>} : memref<1x8x8x16xf32, #tpu.memory_space<vmem>>, vector<1x8x8x16xf32>,
    return
  }
  func.func @transform_0(%arg0: i32) -> (i32, i32, i32, i32) {
    %c0_i32 = arith.constant 0 : i32
    %c0_i32_0 = arith.constant 0 : i32
    %c0_i32_1 = arith.constant 0 : i32
    %c0_i32_2 = arith.constant 0 : i32
    return %arg0, %c0_i32, %c0_i32_0, %c0_i32_1 : i32, i32, i32, i32
  }
  func.func @transform_1(%arg0: i32) -> (i32, i32, i32, i32) {
    %c0_i32 = arith.constant 0 : i32
    %c0_i32_0 = arith.constant 0 : i32
    %c0_i32_1 = arith.constant 0 : i32
    %c0_i32_2 = arith.constant 0 : i32
    return %arg0, %c0_i32, %c0_i32_0, %c0_i32_1 : i32, i32, i32, i32
  }
  func.func @transform_2(%arg0: i32) -> (i32, i32) {
    %c0_i32 = arith.constant 0 : i32
    %c0_i32_0 = arith.constant 0 : i32
    %c0_i32_1 = arith.constant 0 : i32
    return %c0_i32, %c0_i32_0 : i32, i32
  }
  func.func @transform_3(%arg0: i32) -> (i32, i32) {
    %c0_i32 = arith.constant 0 : i32
    %c0_i32_0 = arith.constant 0 : i32
    %c0_i32_1 = arith.constant 0 : i32
    return %c0_i32, %c0_i32_0 : i32, i32
  }
  func.func @transform_4(%arg0: i32) -> (i32, i32) {
    %c0_i32 = arith.constant 0 : i32
    %c0_i32_0 = arith.constant 0 : i32
    %c0_i32_1 = arith.constant 0 : i32
    return %c0_i32, %c0_i32_0 : i32, i32
  }
  func.func @transform_5(%arg0: i32) -> (i32, i32) {
    %c0_i32 = arith.constant 0 : i32
    %c0_i32_0 = arith.constant 0 : i32
    %c0_i32_1 = arith.constant 0 : i32
    return %c0_i32, %c0_i32_0 : i32, i32
  }
  func.func @transform_6(%arg0: i32) -> (i32, i32) {
    %c0_i32 = arith.constant 0 : i32
    %c0_i32_0 = arith.constant 0 : i32
    %c0_i32_1 = arith.constant 0 : i32
    return %c0_i32, %c0_i32_0 : i32, i32
  }
  func.func @transform_7(%arg0: i32) -> (i32, i32, i32, i32) {
    %c0_i32 = arith.constant 0 : i32
    %c0_i32_0 = arith.constant 0 : i32
    %c0_i32_1 = arith.constant 0 : i32
    %c0_i32_2 = arith.constant 0 : i32
    return %arg0, %c0_i32, %c0_i32_0, %c0_i32_1 : i32, i32, i32, i32
  }
}

</mosaic_0001>

<bundles_post_ra>
// kernel: dual_stream_down.1
= control target key start
LH: loop header
LB: loop body
LE: loop exit
PB: predicated region body
PF: predicated region fallthrough
CT: control target
= control target key end

     0   :  { %s2062_s24 = smov 0   ;;  %s2960_s0 = inlined_call_operand.vmem [shape: f32[2,16,8,8], index: 0, kind: input, shape index: {}]   ;;  %s2961_s1 = inlined_call_operand.vmem [shape: f32[2,16,8,8], index: 1, kind: input, shape index: {}]   ;;  %s2962_s2 = inlined_call_operand.vmem [shape: f32[2,4], index: 2, kind: input, shape index: {}]   ;;  %s2963_s3 = inlined_call_operand.vmem [shape: f32[36,16], index: 3, kind: input, shape index: {}]   ;;  %s2964_s4 = inlined_call_operand.vmem [shape: f32[2,16], index: 4, kind: input, shape index: {}]   ;;  %s2965_s5 = inlined_call_operand.vmem [shape: f32[144,16], index: 5, kind: input, shape index: {}]   ;;  %s2966_s6 = inlined_call_operand.vmem [shape: f32[2,16], index: 6, kind: input, shape index: {}]   ;;  %s2967_s7 = inlined_call_operand.vmem [shape: f32[2,8,8,16], index: 7, kind: output, shape index: {}]  }
   0x1 LB: > { %s1723_s25 = sadd.s32 4294967295, %s2004_s24   ;;  %p1727_p0 = scmp.ge.s32.totalorder %s2004_s24, 1  ;;  %s2004_s24 = sphi %s2062_s24, %s17_s24  }
   0x2   : > { %p247_p1 = scmp.lt.s32.totalorder %s2004_s24, 3 }
   0x4   : > { %p248_p2 = pnand %p1727_p0, %p247_p1 }
   0x5   : > { %p284_p3 = scmp.lt.s32.totalorder (!%p248_p2), %s1723_s25, 1  ;;  %p1734_p4 = scmp.ne.s32.totalorder (!%p248_p2), %s1723_s25, 0 }
   0x6   : > { %251 = sbr.rel (%p248_p2) target bundleno = 999 (0x3e7), region = 48 }
   0xb   : > { %s285_s26 = scalar_select %p284_p3, %s1723_s25, 1 }
   0xc   : > { %302 = sbr.rel (%p1734_p4) target bundleno = 38 (0x26), region = 52 }
   0xd   : > { %s1760_s27 = sshll.u32 %s285_s26, 7  ;;  %s1762_s28 = sshll.u32 %s285_s26, 6 }
   0xe   : > { %s2073_s8 = scalar_lea.vmem %s2960_s0, %s1760_s27  ;;  %s2078_s11 = scalar_lea.vmem %s2961_s1, %s1760_s27 }
   0xf   : > { %s2083_s14 = scalar_lea.vmem %s2967_s7, %s1762_s28 }
  0x11   : > { %vm303_vm0 = vcmask 31744   ;;  %vm305_vm1 = vcmask 25600   ;;  %vm325_vm2 = vcmask 130048   ;;  %v2006_v0 = vmov 0.0  }
  0x12   : > { %304 = vst.msk [vmem:[#allocation2] sm:$0xff] %vm303_vm0, %v2006_v0  ;;  %307 = vst.msk [vmem:[#allocation2 + $0x10] sm:$0xff] %vm303_vm0, %v2006_v0  ;;  %vm327_vm3 = vcmask 123904  }
  0x13   : > { %309 = vst.msk [vmem:[#allocation2 + $0x20] sm:$0xff] %vm303_vm0, %v2006_v0  ;;  %311 = vst.msk [vmem:[#allocation2 + $0x30] sm:$0xff] %vm303_vm0, %v2006_v0 }
  0x14   : > { %313 = vst.msk [vmem:[#allocation2 + $0x40] sm:$0xff] %vm303_vm0, %v2006_v0  ;;  %315 = vst.msk [vmem:[#allocation2 + $0x50] sm:$0xff] %vm303_vm0, %v2006_v0 }
  0x15   : > { %317 = vst.msk [vmem:[#allocation2 + $0x60] sm:$0xff] %vm303_vm0, %v2006_v0  ;;  %319 = vst.msk [vmem:[#allocation2 + $0x70] sm:$0xff] %vm303_vm0, %v2006_v0 }
  0x16   : > { %321 = vst.msk [vmem:[#allocation2 + $0x80] sm:$0xff] %vm303_vm0, %v2006_v0  ;;  %323 = vst.msk [vmem:[#allocation2 + $0x90] sm:$0xff] %vm303_vm0, %v2006_v0 }
  0x17   : > { %306 = vst.msk [vmem:[#allocation2 + $0x8] sm:$0x3] %vm305_vm1, %v2006_v0  ;;  %308 = vst.msk [vmem:[#allocation2 + $0x18] sm:$0x3] %vm305_vm1, %v2006_v0 }
  0x18   : > { %310 = vst.msk [vmem:[#allocation2 + $0x28] sm:$0x3] %vm305_vm1, %v2006_v0  ;;  %312 = vst.msk [vmem:[#allocation2 + $0x38] sm:$0x3] %vm305_vm1, %v2006_v0 }
  0x19   : > { %314 = vst.msk [vmem:[#allocation2 + $0x48] sm:$0x3] %vm305_vm1, %v2006_v0  ;;  %316 = vst.msk [vmem:[#allocation2 + $0x58] sm:$0x3] %vm305_vm1, %v2006_v0 }
  0x1a   : > { %318 = vst.msk [vmem:[#allocation2 + $0x68] sm:$0x3] %vm305_vm1, %v2006_v0  ;;  %320 = vst.msk [vmem:[#allocation2 + $0x78] sm:$0x3] %vm305_vm1, %v2006_v0 }
  0x1b   : > { %322 = vst.msk [vmem:[#allocation2 + $0x88] sm:$0x3] %vm305_vm1, %v2006_v0  ;;  %324 = vst.msk [vmem:[#allocation2 + $0x98] sm:$0x3] %vm305_vm1, %v2006_v0 }
  0x1c   : > { %326 = vst.msk [vmem:[#allocation3] sm:$0xff] %vm325_vm2, %v2006_v0  ;;  %329 = vst.msk [vmem:[#allocation3 + $0x10] sm:$0xff] %vm325_vm2, %v2006_v0 }
  0x1d   : > { %331 = vst.msk [vmem:[#allocation3 + $0x20] sm:$0xff] %vm325_vm2, %v2006_v0  ;;  %333 = vst.msk [vmem:[#allocation3 + $0x30] sm:$0xff] %vm325_vm2, %v2006_v0 }
  0x1e   : > { %335 = vst.msk [vmem:[#allocation3 + $0x40] sm:$0xff] %vm325_vm2, %v2006_v0  ;;  %337 = vst.msk [vmem:[#allocation3 + $0x50] sm:$0xff] %vm325_vm2, %v2006_v0 }
  0x1f   : > { %339 = vst.msk [vmem:[#allocation3 + $0x60] sm:$0xff] %vm325_vm2, %v2006_v0  ;;  %341 = vst.msk [vmem:[#allocation3 + $0x70] sm:$0xff] %vm325_vm2, %v2006_v0 }
  0x20   : > { %343 = vst.msk [vmem:[#allocation3 + $0x80] sm:$0xff] %vm325_vm2, %v2006_v0  ;;  %345 = vst.msk [vmem:[#allocation3 + $0x90] sm:$0xff] %vm325_vm2, %v2006_v0 }
  0x21   : > { %328 = vst.msk [vmem:[#allocation3 + $0x8] sm:$0x3] %vm327_vm3, %v2006_v0  ;;  %330 = vst.msk [vmem:[#allocation3 + $0x18] sm:$0x3] %vm327_vm3, %v2006_v0 }
  0x22   : > { %332 = vst.msk [vmem:[#allocation3 + $0x28] sm:$0x3] %vm327_vm3, %v2006_v0  ;;  %334 = vst.msk [vmem:[#allocation3 + $0x38] sm:$0x3] %vm327_vm3, %v2006_v0 }
  0x23   : > { %336 = vst.msk [vmem:[#allocation3 + $0x48] sm:$0x3] %vm327_vm3, %v2006_v0  ;;  %338 = vst.msk [vmem:[#allocation3 + $0x58] sm:$0x3] %vm327_vm3, %v2006_v0 }
  0x24   : > { %340 = vst.msk [vmem:[#allocation3 + $0x68] sm:$0x3] %vm327_vm3, %v2006_v0  ;;  %342 = vst.msk [vmem:[#allocation3 + $0x78] sm:$0x3] %vm327_vm3, %v2006_v0 }
  0x25   : > { %344 = vst.msk [vmem:[#allocation3 + $0x88] sm:$0x3] %vm327_vm3, %v2006_v0  ;;  %346 = vst.msk [vmem:[#allocation3 + $0x98] sm:$0x3] %vm327_vm3, %v2006_v0 }
  0x26 PF: > { %v2106_v1 = vld [vmem:[%s2078_s11] sm:$0xff]  ;;  %s2007_s15 = smov 124   ;;  %v2116_v3 = vld [vmem:[%s2078_s11 + $0x8] sm:$0xff]  ;;  %v2126_v5 = vld [vmem:[%s2073_s8 + $0x18] sm:$0xff]  ;;  %vm635_vm4 = vcmask 1046528   ;;  %vm684_vm5 = vcmask 1045504  }
  0x27   : > { %v2109_v2 = vld [vmem:[%s2073_s8] sm:$0xff]  ;;  %497 = vrot.lane.b32.xlu1 %v2106_v1, %s2007_s15  ;;  %v2119_v4 = vld [vmem:[%s2073_s8 + $0x8] sm:$0xff]  ;;  %v2129_v6 = vld [vmem:[%s2073_s8 + $0x10] sm:$0xff]  ;;  %s2008_s16 = smov 4   ;;  %s2009_s17 = smov 8   ;;  %vm590_vm6 = vcmask 31744  }
  0x28   : > { %380 = vrot.lane.b32.xlu0 %v2109_v2, %s2007_s15  ;;  %v2136_v7 = vld [vmem:[%s2078_s11 + $0x18] sm:$0xff]  ;;  %v2139_v8 = vld [vmem:[%s2078_s11 + $0x10] sm:$0xff]  ;;  %v2146_v9 = vld [vmem:[%s2073_s8 + $0x28] sm:$0xff]  ;;  %s2010_s22 = smov 12   ;;  %s2011_s23 = smov 24   ;;  %vm994_vm7 = vcmask 1043456  }
  0x29   : > { %v2149_v10 = vld [vmem:[%s2073_s8 + $0x20] sm:$0xff]  ;;  %v2156_v11 = vld [vmem:[%s2078_s11 + $0x28] sm:$0xff]  ;;  %v2166_v13 = vld [vmem:[%s2073_s8 + $0x38] sm:$0xff]  ;;  %s2012_s25 = smov 16   ;;  %s2013_s28 = smov 20   ;;  %vm901_vm8 = vcmask 64512  }
  0x2a   : > { %v2159_v12 = vld [vmem:[%s2078_s11 + $0x20] sm:$0xff]  ;;  %v2169_v14 = vld [vmem:[%s2073_s8 + $0x30] sm:$0xff]  ;;  %v2176_v15 = vld [vmem:[%s2078_s11 + $0x38] sm:$0xff]  ;;  %s2014_s12 = smov 28   ;;  %s2015_s18 = smov 32   ;;  %vm910_vm9 = vcmask 97280  }
  0x2b   : > { %499 = vrot.lane.b32.xlu1 %v2116_v3, %s2007_s15  ;;  %v2179_v16 = vld [vmem:[%s2078_s11 + $0x30] sm:$0xff]  ;;  %v2186_v17 = vld [vmem:[%s2073_s8 + $0x48] sm:$0xff]  ;;  %v2189_v18 = vld [vmem:[%s2073_s8 + $0x40] sm:$0xff]  ;;  %vm919_vm10 = vcmask 130048   ;;  %vm928_vm11 = vcmask 162816   ;;  %vm937_vm12 = vcmask 195584  }
  0x2c   : > { %382 = vrot.lane.b32.xlu0 %v2119_v4, %s2007_s15  ;;  %v2196_v19 = vld [vmem:[%s2078_s11 + $0x48] sm:$0xff]  ;;  %v2199_v20 = vld [vmem:[%s2078_s11 + $0x40] sm:$0xff]  ;;  %v2206_v21 = vld [vmem:[%s2073_s8 + $0x58] sm:$0xff]  ;;  %vm946_vm13 = vcmask 228352   ;;  %vm955_vm14 = vcmask 261120   ;;  %vm969_vm15 = vcmask 293888  }
  0x2d   : > { %v2209_v22 = vld [vmem:[%s2073_s8 + $0x50] sm:$0xff]  ;;  %v2216_v23 = vld [vmem:[%s2078_s11 + $0x58] sm:$0xff]  ;;  %v2226_v25 = vld [vmem:[%s2073_s8 + $0x68] sm:$0xff]  ;;  %s2016_s21 = smov 48   ;;  %s2020_s13 = smov 96   ;;  %vm1430_vm0 = vcmask 392192  }
  0x2e   : > { %v2219_v24 = vld [vmem:[%s2078_s11 + $0x50] sm:$0xff]  ;;  %v2229_v26 = vld [vmem:[%s2073_s8 + $0x60] sm:$0xff]  ;;  %v2236_v27 = vld [vmem:[%s2078_s11 + $0x68] sm:$0xff]  ;;  %s2021_s9 = smov 112   ;;  %vm1439_vm1 = vcmask 523264   ;;  %vm1448_vm2 = vcmask 654336  }
  0x2f   : > { %386 = vrot.lane.b32.xlu1 %v2126_v5, %s2007_s15  ;;  %v2239_v28 = vld [vmem:[%s2078_s11 + $0x60] sm:$0xff]  ;;  %v2246_v29 = vld [vmem:[%s2073_s8 + $0x70] sm:$0xff]  ;;  %v2249_v30 = vld [vmem:[%s2073_s8 + $0x78] sm:$0xff]  ;;  %vm1457_vm3 = vcmask 785408  }
  0x30   : > { %384 = vrot.lane.b32.xlu0 %v2129_v6, %s2007_s15  ;;  %v2251_v31 = vld [vmem:[#allocation2] sm:$0xff]  ;;  %v600_v32 = vld [vmem:[#allocation2 + $0x8] sm:$0x3]  ;;  %v2258_v33 = vld [vmem:[%s2078_s11 + $0x70] sm:$0xff] }
  0x31   : > { %v2261_v34 = vld [vmem:[%s2078_s11 + $0x78] sm:$0xff]  ;;  %v636_v35 = vrot.slane %v2251_v31, 1  ;;  %v637_v36 = vrot.slane %v600_v32, 1  ;;  %v685_v38 = vrot.slane %v2251_v31, 2  ;;  %v686_v39 = vrot.slane %v600_v32, 2 }
  0x32   : > { %v2280_v49 = vld [vmem:[%s2962_s2 + $0x1] ss:$0 sm:$0xff]  ;;  %v2285_v50 = vld [vmem:[%s2962_s2] ss:$0 sm:$0xff] }
  0x33   : > { %503 = vrot.lane.b32.xlu1 %v2136_v7, %s2007_s15  ;;  %v638_v37 = vsel %vm635_vm4, %v636_v35, %v637_v36  ;;  %v687_v40 = vsel %vm684_vm5, %v685_v38, %v686_v39 }
  0x34   : > { %501 = vrot.lane.b32.xlu0 %v2139_v8, %s2007_s15 }
  0x37   : > { %390 = vrot.lane.b32.xlu1 %v2146_v9, %s2007_s15 }
  0x38   : > { %388 = vrot.lane.b32.xlu0 %v2149_v10, %s2007_s15 }
  0x3b   : > { %507 = vrot.lane.b32.xlu1 %v2156_v11, %s2007_s15 }
  0x3c   : > { %505 = vrot.lane.b32.xlu0 %v2159_v12, %s2007_s15 }
  0x3f   : > { %394 = vrot.lane.b32.xlu1 %v2166_v13, %s2007_s15 }
  0x40   : > { %392 = vrot.lane.b32.xlu0 %v2169_v14, %s2007_s15 }
  0x43   : > { %511 = vrot.lane.b32.xlu1 %v2176_v15, %s2007_s15 }
  0x44   : > { %509 = vrot.lane.b32.xlu0 %v2179_v16, %s2007_s15 }
  0x47   : > { %398 = vrot.lane.b32.xlu1 %v2186_v17, %s2007_s15 }
  0x48   : > { %396 = vrot.lane.b32.xlu0 %v2189_v18, %s2007_s15 }
  0x4b   : > { %515 = vrot.lane.b32.xlu1 %v2196_v19, %s2007_s15 }
  0x4c   : > { %513 = vrot.lane.b32.xlu0 %v2199_v20, %s2007_s15 }
  0x4f   : > { %402 = vrot.lane.b32.xlu1 %v2206_v21, %s2007_s15 }
  0x50   : > { %400 = vrot.lane.b32.xlu0 %v2209_v22, %s2007_s15 }
  0x53   : > { %519 = vrot.lane.b32.xlu1 %v2216_v23, %s2007_s15 }
  0x54   : > { %517 = vrot.lane.b32.xlu0 %v2219_v24, %s2007_s15 }
  0x57   : > { %406 = vrot.lane.b32.xlu1 %v2226_v25, %s2007_s15 }
  0x58   : > { %404 = vrot.lane.b32.xlu0 %v2229_v26, %s2007_s15 }
  0x5b   : > { %523 = vrot.lane.b32.xlu1 %v2236_v27, %s2007_s15 }
  0x5c   : > { %521 = vrot.lane.b32.xlu0 %v2239_v28, %s2007_s15 }
  0x5f   : > { %410 = vrot.lane.b32.xlu1 %v2249_v30, %s2007_s15 }
  0x60   : > { %408 = vrot.lane.b32.xlu0 %v2246_v29, %s2007_s15 }
  0x63   : > { %527 = vrot.lane.b32.xlu1 %v2261_v34, %s2007_s15 }
  0x64   : > { %525 = vrot.lane.b32.xlu0 %v2258_v33, %s2007_s15 }
  0x68   : > { %660 = vrot.lane.b32.xlu0 %v638_v37, %s2008_s16 }
  0x6c   : > { %709 = vrot.lane.b32.xlu0 %v687_v40, %s2009_s17 }
  0x99   : > { %v498_v41 = vpop.permute.xlu1 %497 }
  0x9a   : > { %v381_v42 = vpop.permute.xlu0 %380  ;;  %v545_v45 = vmax.f32 %v2106_v1, %v498_v41 }
  0x9b   : > { %v428_v46 = vmax.f32 %v2109_v2, %v381_v42 }
  0x9d   : > { %v500_v43 = vpop.permute.xlu1 %499 }
  0x9e   : > { %v383_v44 = vpop.permute.xlu0 %382  ;;  %v546_v47 = vmax.f32 %v2116_v3, %v500_v43 }
  0x9f   : > { %v429_v48 = vmax.f32 %v2119_v4, %v383_v44 }
  0xa0   : > { %v561_v51 = vmax.f32 %v545_v45, %v546_v47 }
  0xa1   : > { %v444_v52 = vmax.f32 %v428_v46, %v429_v48  ;;  %v387_v53 = vpop.permute.xlu1 %386 }
  0xa2   : > { %v385_v54 = vpop.permute.xlu0 %384  ;;  %v573_v55 = vmul.f32 %v2280_v49, %v561_v51  ;;  %v431_v57 = vmax.f32 %v2126_v5, %v387_v53 }
  0xa3   : > { %v456_v56 = vmul.f32 %v2285_v50, %v444_v52  ;;  %v430_v58 = vmax.f32 %v2129_v6, %v385_v54 }
  0xa5   : > { %v581_v59 = vadd.f32 %v573_v55, %v456_v56  ;;  %v504_v60 = vpop.permute.xlu1 %503  ;;  %v445_v62 = vmax.f32 %v430_v58, %v431_v57 }
  0xa6   : > { %v502_v61 = vpop.permute.xlu0 %501  ;;  %v548_v63 = vmax.f32 %v2136_v7, %v504_v60 }
  0xa7   : > { %591 = vst.msk [vmem:[#allocation2 + $0x11] sm:$0xff] %vm590_vm6, %v581_v59  ;;  %v547_v0 = vmax.f32 %v2139_v8, %v502_v61  ;;  %v457_v4 = vmul.f32 %v2285_v50, %v445_v62 }
  0xa9   : > { %v562_v1 = vmax.f32 %v547_v0, %v548_v63  ;;  %v391_v2 = vpop.permute.xlu1 %390 }
  0xaa   : > { %v389_v3 = vpop.permute.xlu0 %388  ;;  %v433_v6 = vmax.f32 %v2146_v9, %v391_v2 }
  0xab   : > { %v574_v5 = vmul.f32 %v2280_v49, %v562_v1  ;;  %v432_v32 = vmax.f32 %v2149_v10, %v389_v3 }
  0xad   : > { %v582_v35 = vadd.f32 %v574_v5, %v457_v4  ;;  %v508_v36 = vpop.permute.xlu1 %507  ;;  %v446_v7 = vmax.f32 %v432_v32, %v433_v6 }
  0xae   : > { %v506_v37 = vpop.permute.xlu0 %505  ;;  %v2298_v38 = vld [vmem:[#allocation2 + $0x10] sm:$0xff]  ;;  %v550_v8 = vmax.f32 %v2156_v11, %v508_v36  ;;  %v602_v6 = vld [vmem:[#allocation2 + $0x18] sm:$0x3] }
  0xaf   : > { %592 = vst.msk [vmem:[#allocation2 + $0x21] sm:$0xff] %vm590_vm6, %v582_v35  ;;  %v549_v39 = vmax.f32 %v2159_v12, %v506_v37  ;;  %734 = vrot.lane.b32.xlu0 %v2298_v38, %s2010_s22  ;;  %v458_v10 = vmul.f32 %v2285_v50, %v446_v7  ;;  %v640_v36 = vrot.slane %v602_v6, 1 }
  0xb1   : > { %v563_v40 = vmax.f32 %v549_v39, %v550_v8  ;;  %v395_v9 = vpop.permute.xlu1 %394 }
  0xb2   : > { %v393_v41 = vpop.permute.xlu0 %392  ;;  %v435_v43 = vmax.f32 %v2166_v13, %v395_v9 }
  0xb3   : > { %v575_v42 = vmul.f32 %v2280_v49, %v563_v40  ;;  %v434_v44 = vmax.f32 %v2169_v14, %v393_v41 }
  0xb5   : > { %v583_v45 = vadd.f32 %v575_v42, %v458_v10  ;;  %v512_v46 = vpop.permute.xlu1 %511  ;;  %v447_v12 = vmax.f32 %v434_v44, %v435_v43 }
  0xb6   : > { %v510_v11 = vpop.permute.xlu0 %509  ;;  %v2309_v47 = vld [vmem:[#allocation2 + $0x20] sm:$0xff]  ;;  %v552_v48 = vmax.f32 %v2176_v15, %v512_v46 }
  0xb7   : > { %593 = vst.msk [vmem:[#allocation2 + $0x31] sm:$0xff] %vm590_vm6, %v583_v45  ;;  %v551_v51 = vmax.f32 %v2179_v16, %v510_v11  ;;  %736 = vrot.lane.b32.xlu1 %v2309_v47, %s2010_s22  ;;  %v459_v14 = vmul.f32 %v2285_v50, %v447_v12 }
  0xb9   : > { %v564_v52 = vmax.f32 %v551_v51, %v552_v48  ;;  %v399_v53 = vpop.permute.xlu1 %398  ;;  %v688_v48 = vrot.slane %v2298_v38, 2  ;;  %v689_v51 = vrot.slane %v602_v6, 2 }
  0xba   : > { %v397_v13 = vpop.permute.xlu0 %396  ;;  %v437_v55 = vmax.f32 %v2186_v17, %v399_v53 }
  0xbb   : > { %v576_v54 = vmul.f32 %v2280_v49, %v564_v52  ;;  %v436_v56 = vmax.f32 %v2189_v18, %v397_v13  ;;  %814 = vrot.lane.b32.xlu1 %v2309_v47, %s2011_s23 }
  0xbd   : > { %v584_v15 = vadd.f32 %v576_v54, %v459_v14  ;;  %v516_v16 = vpop.permute.xlu1 %515  ;;  %v448_v59 = vmax.f32 %v436_v56, %v437_v55 }
  0xbe   : > { %v514_v57 = vpop.permute.xlu0 %513  ;;  %v2322_v58 = vld [vmem:[#allocation2 + $0x30] sm:$0xff]  ;;  %v554_v60 = vmax.f32 %v2196_v19, %v516_v16 }
  0xbf   : > { %594 = vst.msk [vmem:[#allocation2 + $0x41] sm:$0xff] %vm590_vm6, %v584_v15  ;;  %v553_v61 = vmax.f32 %v2199_v20, %v514_v57  ;;  %738 = vrot.lane.b32.xlu1 %v2322_v58, %s2010_s22  ;;  %816 = vrot.lane.b32.xlu0 %v2322_v58, %s2011_s23  ;;  %v460_v63 = vmul.f32 %v2285_v50, %v448_v59  ;;  %v645_v52 = vrot.slane %v2322_v58, 1  ;;  %v691_v59 = vrot.slane %v2309_v47, 2 }
  0xc0   : > { %v690_v15 = vsel %vm684_vm5, %v688_v48, %v689_v51 }
  0xc1   : > { %v565_v17 = vmax.f32 %v553_v61, %v554_v60  ;;  %v403_v18 = vpop.permute.xlu1 %402 }
  0xc2   : > { %v401_v62 = vpop.permute.xlu0 %400  ;;  %v439_v1 = vmax.f32 %v2206_v21, %v403_v18  ;;  %v639_v21 = vrot.slane %v2298_v38, 1 }
  0xc3   : > { %v577_v0 = vmul.f32 %v2280_v49, %v565_v17  ;;  %v438_v2 = vmax.f32 %v2209_v22, %v401_v62  ;;  %v604_v22 = vld [vmem:[#allocation2 + $0x28] sm:$0x3] }
  0xc4   : > { %v643_v41 = vrot.slane %v604_v22, 1  ;;  %v641_v42 = vsel %vm635_vm4, %v639_v21, %v640_v36  ;;  %v692_v60 = vrot.slane %v604_v22, 2 }
  0xc5   : > { %v585_v19 = vadd.f32 %v577_v0, %v460_v63  ;;  %v449_v20 = vmax.f32 %v438_v2, %v439_v1  ;;  %v520_v4 = vpop.permute.xlu1 %519  ;;  %v694_v1 = vrot.slane %v2322_v58, 2 }
  0xc6   : > { %v2335_v3 = vld [vmem:[#allocation2 + $0x40] sm:$0xff]  ;;  %v518_v5 = vpop.permute.xlu0 %517  ;;  %v556_v32 = vmax.f32 %v2216_v23, %v520_v4  ;;  %v693_v0 = vsel %vm684_vm5, %v691_v59, %v692_v60  ;;  %v966_v4 = vld [vmem:[%s2963_s3 + $0x10] sm:$0xff] }
  0xc7   : > { %595 = vst.msk [vmem:[#allocation2 + $0x51] sm:$0xff] %vm590_vm6, %v585_v19  ;;  %740 = vrot.lane.b32.xlu0 %v2335_v3, %s2010_s22  ;;  %v555_v35 = vmax.f32 %v2219_v24, %v518_v5  ;;  %v461_v37 = vmul.f32 %v2285_v50, %v449_v20  ;;  %v642_v24 = vrot.slane %v2309_v47, 1  ;;  %v968_v19 = vld [vmem:[%s2963_s3 + $0x20] sm:$0xf]  ;;  %v608_v5 = vld [vmem:[#allocation2 + $0x48] sm:$0x3] }
  0xc8   : > { %1776 = vmatprep.subr.msk.mxu0 %vm994_vm7, %v968_v19  ;;  %v648_v6 = vrot.slane %v2335_v3, 1 }
  0xc9   : > { %v566_v7 = vmax.f32 %v555_v35, %v556_v32  ;;  %v407_v8 = vpop.permute.xlu1 %406  ;;  %v2360_v12 = vsel %vm635_vm4, %v642_v24, %v643_v41  ;;  %1777 = vmatpush3.msk.msra.mxu0 %vm994_vm7, %v968_v19  ;;  %v649_v32 = vrot.slane %v608_v5, 1  ;;  %v964_v35 = vld [vmem:[%s2963_s3] sm:$0xff] }
  0xca   : > { %v405_v39 = vpop.permute.xlu0 %404  ;;  %v441_v40 = vmax.f32 %v2226_v25, %v407_v8  ;;  %v606_v25 = vld [vmem:[#allocation2 + $0x38] sm:$0x3]  ;;  %v697_v8 = vrot.slane %v2335_v3, 2 }
  0xcb   : > { %818 = vrot.lane.b32.xlu0 %v2335_v3, %s2011_s23  ;;  %v440_v9 = vmax.f32 %v2229_v26, %v405_v39  ;;  %v578_v23 = vmul.f32 %v2280_v49, %v566_v7  ;;  %v646_v53 = vrot.slane %v606_v25, 1  ;;  %v695_v2 = vrot.slane %v606_v25, 2 }
  0xcc   : > { %v650_v21 = vsel %vm635_vm4, %v648_v6, %v649_v32  ;;  %v698_v39 = vrot.slane %v608_v5, 2 }
  0xcd   : > { %v586_v43 = vadd.f32 %v578_v23, %v461_v37  ;;  %v450_v44 = vmax.f32 %v440_v9, %v441_v40  ;;  %v524_v45 = vpop.permute.xlu1 %523  ;;  %v647_v57 = vsel %vm635_vm4, %v645_v52, %v646_v53  ;;  %v696_v20 = vsel %vm684_vm5, %v694_v1, %v695_v2 }
  0xce   : > { %v2350_v10 = vld [vmem:[#allocation2 + $0x50] sm:$0xff]  ;;  %v522_v46 = vpop.permute.xlu0 %521  ;;  %v558_v26 = vmax.f32 %v2236_v27, %v524_v45  ;;  %v610_v36 = vld [vmem:[#allocation2 + $0x58] sm:$0x3]  ;;  %v699_v40 = vsel %vm684_vm5, %v697_v8, %v698_v39 }
  0xcf   : > { %820 = vrot.lane.b32.xlu1 %v2350_v10, %s2011_s23  ;;  %762 = vrot.lane.b32.xlu0 %v641_v42, %s2012_s25  ;;  %596 = vst.msk [vmem:[#allocation2 + $0x61] sm:$0xff] %vm590_vm6, %v586_v43  ;;  %v557_v11 = vmax.f32 %v2239_v28, %v522_v46  ;;  %v462_v13 = vmul.f32 %v2285_v50, %v450_v44  ;;  %v651_v22 = vrot.slane %v2350_v10, 1  ;;  %v652_v37 = vrot.slane %v610_v36, 1 }
  0xd0   : > { %v700_v9 = vrot.slane %v2350_v10, 2  ;;  %v701_v23 = vrot.slane %v610_v36, 2 }
  0xd1   : > { %v567_v14 = vmax.f32 %v557_v11, %v558_v26  ;;  %v411_v55 = vpop.permute.xlu1 %410  ;;  %v653_v7 = vsel %vm635_vm4, %v651_v22, %v652_v37 }
  0xd2   : > { %v409_v54 = vpop.permute.xlu0 %408  ;;  %v443_v28 = vmax.f32 %v2249_v30, %v411_v55  ;;  %v702_v24 = vsel %vm684_vm5, %v700_v9, %v701_v23 }
  0xd3   : > { %764 = vrot.lane.b32.xlu0 %v2360_v12, %s2012_s25  ;;  %662 = vrot.lane.b32.xlu1 %v641_v42, %s2008_s16  ;;  %v442_v27 = vmax.f32 %v2246_v29, %v409_v54  ;;  %v579_v56 = vmul.f32 %v2280_v49, %v567_v14 }
  0xd5   : > { %v451_v16 = vmax.f32 %v442_v27, %v443_v28  ;;  %v587_v61 = vadd.f32 %v579_v56, %v462_v13  ;;  %v528_v18 = vpop.permute.xlu1 %527 }
  0xd6   : > { %v526_v17 = vpop.permute.xlu0 %525  ;;  %v560_v30 = vmax.f32 %v2261_v34, %v528_v18  ;;  %v967_v34 = vld [vmem:[%s2963_s3 + $0x18] sm:$0xff]  ;;  %v2435_v41 = vld [vmem:[#allocation2 + $0x60] sm:$0xff]  ;;  %v612_v42 = vld [vmem:[#allocation2 + $0x68] sm:$0x3] }
  0xd7   : > { %666 = vrot.lane.b32.xlu0 %v647_v57, %s2008_s16  ;;  %711 = vrot.lane.b32.xlu1 %v690_v15, %s2009_s17  ;;  %v559_v29 = vmax.f32 %v2258_v33, %v526_v17  ;;  %597 = vst.msk [vmem:[#allocation2 + $0x71] sm:$0xff] %vm590_vm6, %v587_v61  ;;  %v463_v62 = vmul.f32 %v2285_v50, %v451_v16  ;;  %v654_v43 = vrot.slane %v2435_v41, 1  ;;  %v655_v44 = vrot.slane %v612_v42, 1  ;;  %v617_v17 = vld [vmem:[#allocation2 + $0x90] sm:$0xff]  ;;  %v618_v18 = vld [vmem:[#allocation2 + $0x98] sm:$0x3] }
  0xd8   : > { %1778 = vmatprep.subr.mxu0 %v967_v34  ;;  %v703_v26 = vrot.slane %v2435_v41, 2  ;;  %v704_v11 = vrot.slane %v612_v42, 2  ;;  %v866_v1 = vrot.slane %v617_v17, 2  ;;  %v867_v19 = vrot.slane %v618_v18, 2 }
  0xd9   : > { %v568_v63 = vmax.f32 %v559_v29, %v560_v30  ;;  %1779 = vmatpush3.msra.mxu0 %v967_v34  ;;  %v656_v25 = vsel %vm635_vm4, %v654_v43, %v655_v44  ;;  %v839_v30 = vrot.slane %v617_v17, 1 }
  0xda   : > { %1780 = vmatprep.subr.mxu0 %v966_v4  ;;  %v705_v51 = vsel %vm684_vm5, %v703_v26, %v704_v11  ;;  %v661_v54 = vpop.permute.xlu0 %660  ;;  %v868_v34 = vsel %vm684_vm5, %v866_v1, %v867_v19 }
  0xdb   : > { %791 = vrot.lane.b32.xlu0 %v693_v0, %s2013_s28  ;;  %664 = vrot.lane.b32.xlu1 %v2360_v12, %s2008_s16  ;;  %v580_v33 = vmul.f32 %v2280_v49, %v568_v63  ;;  %v965_v49 = vld [vmem:[%s2963_s3 + $0x8] sm:$0xff]  ;;  %v893_v8 = vsel %vm590_vm6, %v2251_v31, %v661_v54 }
  0xdc   : > { %1781 = vmatpush3.msra.mxu0 %v966_v4 }
  0xdd   : > { %v588_v50 = vadd.f32 %v580_v33, %v463_v62  ;;  %1782 = vmatprep.subr.mxu0 %v965_v49  ;;  %v840_v62 = vrot.slane %v618_v18, 1 }
  0xde   : > { %1783 = vmatpush3.msra.mxu0 %v965_v49  ;;  %v2442_v45 = vld [vmem:[#allocation2 + $0x70] sm:$0xff]  ;;  %v614_v46 = vld [vmem:[#allocation2 + $0x78] sm:$0x3] }
  0xdf   : > { %715 = vrot.lane.b32.xlu0 %v696_v20, %s2009_s17  ;;  %789 = vrot.lane.b32.xlu1 %v690_v15, %s2013_s28  ;;  %598 = vst.msk [vmem:[#allocation2 + $0x81] sm:$0xff] %vm590_vm6, %v588_v50  ;;  %v707_v48 = vrot.slane %v614_v46, 2  ;;  %v657_v53 = vrot.slane %v2442_v45, 1  ;;  %v658_v13 = vrot.slane %v614_v46, 1  ;;  %v710_v15 = vpop.permute.xlu0 %709  ;;  %v841_v2 = vsel %vm635_vm4, %v839_v30, %v840_v62 }
  0xe0   : > { %1784 = vmatprep.subr.mxu0 %v964_v35  ;;  %v902_v23 = vsel %vm901_vm8, %v893_v8, %v710_v15 }
  0xe1   : > { %1785 = vmatpush3.msra.mxu0 %v964_v35  ;;  %v659_v14 = vsel %vm635_vm4, %v657_v53, %v658_v13 }
  0xe3   : > { %844 = vrot.lane.b32.xlu0 %v647_v57, %s2014_s12  ;;  %713 = vrot.lane.b32.xlu1 %v693_v0, %s2009_s17 }
  0xe6   : > { %v615_v55 = vld [vmem:[#allocation2 + $0x80] sm:$0xff]  ;;  %v616_v27 = vld [vmem:[#allocation2 + $0x88] sm:$0x3] }
  0xe7   : > { %768 = vrot.lane.b32.xlu0 %v650_v21, %s2012_s25  ;;  %842 = vrot.lane.b32.xlu1 %v2360_v12, %s2014_s12  ;;  %v706_v12 = vrot.slane %v2442_v45, 2  ;;  %v759_v28 = vrot.slane %v615_v55, 1  ;;  %v760_v56 = vrot.slane %v616_v27, 1  ;;  %v787_v59 = vrot.slane %v616_v27, 2 }
  0xe9   : > { %v708_v52 = vsel %vm684_vm5, %v706_v12, %v707_v48  ;;  %v761_v16 = vsel %vm635_vm4, %v759_v28, %v760_v56 }
  0xeb   : > { %871 = vrot.lane.b32.xlu0 %v696_v20, %s2015_s18  ;;  %766 = vrot.lane.b32.xlu1 %v647_v57, %s2012_s25  ;;  %v786_v57 = vrot.slane %v615_v55, 2 }
  0xed   : > { %v788_v29 = vsel %vm684_vm5, %v786_v57, %v787_v59 }
  0xef   : > { %846 = vrot.lane.b32.xlu0 %v650_v21, %s2014_s12  ;;  %869 = vrot.lane.b32.xlu1 %v693_v0, %s2015_s18 }
  0xf3   : > { %848 = vrot.lane.b32.xlu0 %v653_v7, %s2014_s12  ;;  %793 = vrot.lane.b32.xlu1 %v696_v20, %s2013_s28 }
  0xf7   : > { %670 = vrot.lane.b32.xlu0 %v653_v7, %s2008_s16  ;;  %795 = vrot.lane.b32.xlu1 %v699_v40, %s2013_s28 }
  0xfb   : > { %875 = vrot.lane.b32.xlu0 %v702_v24, %s2015_s18  ;;  %668 = vrot.lane.b32.xlu1 %v650_v21, %s2008_s16 }
  0xff   : > { %742 = vrot.lane.b32.xlu0 %v2350_v10, %s2010_s22  ;;  %873 = vrot.lane.b32.xlu1 %v699_v40, %s2015_s18 }
 0x103   : > { %770 = vrot.lane.b32.xlu0 %v653_v7, %s2012_s25  ;;  %717 = vrot.lane.b32.xlu1 %v699_v40, %s2009_s17 }
 0x107   : > { %797 = vrot.lane.b32.xlu0 %v702_v24, %s2013_s28  ;;  %719 = vrot.lane.b32.xlu1 %v702_v24, %s2009_s17 }
 0x10b   : > { %822 = vrot.lane.b32.xlu0 %v2435_v41, %s2011_s23  ;;  %744 = vrot.lane.b32.xlu1 %v2435_v41, %s2010_s22 }
 0x10f   : > { %850 = vrot.lane.b32.xlu0 %v656_v25, %s2014_s12  ;;  %772 = vrot.lane.b32.xlu1 %v656_v25, %s2012_s25 }
 0x113   : > { %877 = vrot.lane.b32.xlu0 %v705_v51, %s2015_s18  ;;  %799 = vrot.lane.b32.xlu1 %v705_v51, %s2013_s28 }
 0x117   : > { %879 = vrot.lane.b32.xlu0 %v708_v52, %s2015_s18  ;;  %824 = vrot.lane.b32.xlu1 %v2442_v45, %s2011_s23 }
 0x11b   : > { %721 = vrot.lane.b32.xlu0 %v705_v51, %s2009_s17  ;;  %852 = vrot.lane.b32.xlu1 %v659_v14, %s2014_s12 }
 0x11f   : > { %746 = vrot.lane.b32.xlu0 %v2442_v45, %s2010_s22  ;;  %672 = vrot.lane.b32.xlu1 %v656_v25, %s2008_s16 }
 0x121   : > { %v735_v60 = vpop.permute.xlu0 %734 }
 0x122   : > { %v911_v44 = vsel %vm910_vm9, %v902_v23, %v735_v60 }
 0x123   : > { %774 = vrot.lane.b32.xlu0 %v659_v14, %s2012_s25  ;;  %674 = vrot.lane.b32.xlu1 %v659_v14, %s2008_s16 }
 0x127   : > { %801 = vrot.lane.b32.xlu0 %v708_v52, %s2013_s28  ;;  %723 = vrot.lane.b32.xlu1 %v708_v52, %s2009_s17 }
 0x129   : > { %v737_v61 = vpop.permute.xlu1 %736 }
 0x12b   : > { %826 = vrot.lane.b32.xlu0 %v615_v55, %s2011_s23  ;;  %748 = vrot.lane.b32.xlu1 %v615_v55, %s2010_s22  ;;  %s2017_s22 = smov 64  }
 0x12d   : > { %v815_v0 = vpop.permute.xlu1 %814 }
 0x12f   : > { %854 = vrot.lane.b32.xlu0 %v761_v16, %s2014_s12  ;;  %776 = vrot.lane.b32.xlu1 %v761_v16, %s2012_s25 }
 0x131   : > { %v817_v63 = vpop.permute.xlu0 %816  ;;  %v739_v50 = vpop.permute.xlu1 %738 }
 0x133   : > { %881 = vrot.lane.b32.xlu0 %v788_v29, %s2015_s18  ;;  %803 = vrot.lane.b32.xlu1 %v788_v29, %s2013_s28 }
 0x137   : > { %828 = vrot.lane.b32.xlu1 %v617_v17, %s2011_s23  ;;  %s2018_s23 = smov 80  }
 0x139   : > { %v741_v33 = vpop.permute.xlu0 %740 }
 0x13b   : > { %856 = vrot.lane.b32.xlu1 %v841_v2, %s2014_s12 }
 0x13d   : > { %v2479_v20 = vpop.permute.xlu0 %818 }
 0x13f   : > { %883 = vrot.lane.b32.xlu1 %v868_v34, %s2015_s18 }
 0x141   : > { %v821_v4 = vpop.permute.xlu1 %820  ;;  %v763_v5 = vpop.permute.xlu0 %762 }
 0x142   : > { %v920_v46 = vsel %vm919_vm10, %v911_v44, %v763_v5 }
 0x145   : > { %v765_v49 = vpop.permute.xlu0 %764  ;;  %v663_v6 = vpop.permute.xlu1 %662 }
 0x146   : > { %v894_v7 = vsel %vm590_vm6, %v2298_v38, %v663_v6 }
 0x149   : > { %v667_v32 = vpop.permute.xlu0 %666  ;;  %v712_v35 = vpop.permute.xlu1 %711 }
 0x14a   : > { %v903_v39 = vsel %vm901_vm8, %v894_v7, %v712_v35  ;;  %v896_v55 = vsel %vm590_vm6, %v2322_v58, %v667_v32 }
 0x14b   : > { %v912_v24 = vsel %vm910_vm9, %v903_v39, %v737_v61 }
 0x14c   : > { %v921_v38 = vsel %vm919_vm10, %v912_v24, %v765_v49 }
 0x14d   : > { %v792_v21 = vpop.permute.xlu0 %791  ;;  %v665_v36 = vpop.permute.xlu1 %664 }
 0x14e   : > { %v930_v11 = vsel %vm928_vm11, %v921_v38, %v792_v21  ;;  %v895_v27 = vsel %vm590_vm6, %v2309_v47, %v665_v36 }
 0x14f   : > { %v939_v48 = vsel %vm937_vm12, %v930_v11, %v817_v63 }
 0x151   : > { %v716_v22 = vpop.permute.xlu0 %715  ;;  %v790_v37 = vpop.permute.xlu1 %789 }
 0x152   : > { %v929_v31 = vsel %vm928_vm11, %v920_v46, %v790_v37  ;;  %v905_v28 = vsel %vm901_vm8, %v896_v55, %v716_v22 }
 0x153   : > { %v938_v12 = vsel %vm937_vm12, %v929_v31, %v815_v0  ;;  %v914_v57 = vsel %vm910_vm9, %v905_v28, %v741_v33 }
 0x155   : > { %v845_v40 = vpop.permute.xlu0 %844  ;;  %v714_v9 = vpop.permute.xlu1 %713 }
 0x156   : > { %v948_v13 = vsel %vm946_vm13, %v939_v48, %v845_v40  ;;  %v904_v16 = vsel %vm901_vm8, %v895_v27, %v714_v9 }
 0x157   : > { %v913_v60 = vsel %vm910_vm9, %v904_v16, %v739_v50 }
 0x159   : > { %v769_v42 = vpop.permute.xlu0 %768  ;;  %v843_v43 = vpop.permute.xlu1 %842 }
 0x15a   : > { %v947_v51 = vsel %vm946_vm13, %v938_v12, %v843_v43  ;;  %v923_v59 = vsel %vm919_vm10, %v914_v57, %v769_v42 }
 0x15d   : > { %v872_v25 = vpop.permute.xlu0 %871  ;;  %v767_v26 = vpop.permute.xlu1 %766 }
 0x15e   : > { %v957_v54 = vsel %vm955_vm14, %v948_v13, %v872_v25  ;;  %v922_v58 = vsel %vm919_vm10, %v913_v60, %v767_v26 }
 0x161   : > { %v847_v52 = vpop.permute.xlu0 %846  ;;  %v870_v53 = vpop.permute.xlu1 %869 }
 0x162   : > { %v956_v14 = vsel %vm955_vm14, %v947_v51, %v870_v53 }
 0x163   : > { %1786 = vmatprep.mubr.msk.f32.mxu0 %vm969_vm15, %v956_v14 }
 0x164   : > { %1787 = vmatmul.mubr.msk.f32.vlgmr.msra.gmra.mxu0 %vm969_vm15, %v957_v54 }
 0x165   : > { %v849_v56 = vpop.permute.xlu0 %848  ;;  %v794_v15 = vpop.permute.xlu1 %793 }
 0x166   : > { %v931_v47 = vsel %vm928_vm11, %v922_v58, %v794_v15 }
 0x167   : > { %v940_v63 = vsel %vm937_vm12, %v931_v47, %v2479_v20 }
 0x168   : > { %v949_v2 = vsel %vm946_vm13, %v940_v63, %v847_v52 }
 0x169   : > { %v671_v61 = vpop.permute.xlu0 %670  ;;  %v796_v17 = vpop.permute.xlu1 %795 }
 0x16a   : > { %v932_v18 = vsel %vm928_vm11, %v923_v59, %v796_v17  ;;  %v898_v23 = vsel %vm590_vm6, %v2350_v10, %v671_v61 }
 0x16b   : > { %v941_v29 = vsel %vm937_vm12, %v932_v18, %v821_v4 }
 0x16c   : > { %v950_v0 = vsel %vm946_vm13, %v941_v29, %v849_v56 }
 0x16d   : > { %v876_v30 = vpop.permute.xlu0 %875  ;;  %v669_v62 = vpop.permute.xlu1 %668 }
 0x16e   : > { %v959_v34 = vsel %vm955_vm14, %v950_v0, %v876_v30  ;;  %v897_v5 = vsel %vm590_vm6, %v2335_v3, %v669_v62 }
 0x171   : > { %v743_v1 = vpop.permute.xlu0 %742  ;;  %v874_v19 = vpop.permute.xlu1 %873 }
 0x172   : > { %v958_v33 = vsel %vm955_vm14, %v949_v2, %v874_v19 }
 0x173   : > { %1789 = vmatprep.mubr.msk.f32.mxu0 %vm969_vm15, %v958_v33 }
 0x174   : > { %1790 = vmatmul.mubr.msk.f32.gmra.mxu0 %vm969_vm15, %v959_v34  ;;  %v2571_v34 = vld [vmem:[%s2964_s4 + $0x1] ss:$0 sm:$0xff] }
 0x175   : > { %v771_v50 = vpop.permute.xlu0 %770  ;;  %v718_v4 = vpop.permute.xlu1 %717 }
 0x176   : > { %v906_v6 = vsel %vm901_vm8, %v897_v5, %v718_v4 }
 0x177   : > { %v915_v32 = vsel %vm910_vm9, %v906_v6, %v743_v1 }
 0x178   : > { %v924_v36 = vsel %vm919_vm10, %v915_v32, %v771_v50 }
 0x179   : > { %v798_v20 = vpop.permute.xlu0 %797  ;;  %v720_v49 = vpop.permute.xlu1 %719 }
 0x17a   : > { %v933_v7 = vsel %vm928_vm11, %v924_v36, %v798_v20  ;;  %v907_v24 = vsel %vm901_vm8, %v898_v23, %v720_v49 }
 0x17d   : > { %v823_v35 = vpop.permute.xlu0 %822  ;;  %v745_v21 = vpop.permute.xlu1 %744 }
 0x17e   : > { %v942_v8 = vsel %vm937_vm12, %v933_v7, %v823_v35  ;;  %v916_v44 = vsel %vm910_vm9, %v907_v24, %v745_v21 }
 0x181   : > { %v851_v22 = vpop.permute.xlu0 %850  ;;  %v773_v37 = vpop.permute.xlu1 %772 }
 0x182   : > { %v951_v39 = vsel %vm946_vm13, %v942_v8, %v851_v22  ;;  %v925_v38 = vsel %vm919_vm10, %v916_v44, %v773_v37 }
 0x185   : > { %v878_v40 = vpop.permute.xlu0 %877  ;;  %v800_v3 = vpop.permute.xlu1 %799 }
 0x186   : > { %v960_v9 = vsel %vm955_vm14, %v951_v39, %v878_v40  ;;  %v934_v46 = vsel %vm928_vm11, %v925_v38, %v800_v3 }
 0x187   : > { %1792 = vmatprep.mubr.msk.f32.mxu0 %vm969_vm15, %v960_v9 }
 0x189   : > { %v880_v42 = vpop.permute.xlu0 %879  ;;  %v825_v43 = vpop.permute.xlu1 %824 }
 0x18a   : > { %v943_v31 = vsel %vm937_vm12, %v934_v46, %v825_v43 }
 0x18d   : > { %v722_v25 = vpop.permute.xlu0 %721  ;;  %v853_v26 = vpop.permute.xlu1 %852 }
 0x18e   : > { %v952_v11 = vsel %vm946_vm13, %v943_v31, %v853_v26 }
 0x18f   : > { %v961_v12 = vsel %vm955_vm14, %v952_v11, %v880_v42 }
 0x190   : > { %1793 = vmatmul.mubr.msk.f32.gmra.mxu0 %vm969_vm15, %v961_v12 }
 0x191   : > { %v747_v10 = vpop.permute.xlu0 %746  ;;  %v673_v48 = vpop.permute.xlu1 %672 }
 0x192   : > { %v899_v53 = vsel %vm590_vm6, %v2435_v41, %v673_v48 }
 0x193   : > { %v908_v54 = vsel %vm901_vm8, %v899_v53, %v722_v25 }
 0x194   : > { %v917_v28 = vsel %vm910_vm9, %v908_v54, %v747_v10 }
 0x195   : > { %v775_v51 = vpop.permute.xlu0 %774  ;;  %v675_v52 = vpop.permute.xlu1 %674 }
 0x196   : > { %v926_v16 = vsel %vm919_vm10, %v917_v28, %v775_v51  ;;  %v900_v18 = vsel %vm590_vm6, %v2442_v45, %v675_v52  ;;  %v2566_v45 = vld [vmem:[%s2964_s4] ss:$0 sm:$0xff] }
 0x199   : > { %v802_v13 = vpop.permute.xlu0 %801  ;;  %v724_v14 = vpop.permute.xlu1 %723 }
 0x19a   : > { %v935_v57 = vsel %vm928_vm11, %v926_v16, %v802_v13  ;;  %v909_v47 = vsel %vm901_vm8, %v900_v18, %v724_v14 }
 0x19d   : > { %v827_v55 = vpop.permute.xlu0 %826  ;;  %v749_v27 = vpop.permute.xlu1 %748 }
 0x19e   : > { %v944_v59 = vsel %vm937_vm12, %v935_v57, %v827_v55  ;;  %v918_v29 = vsel %vm910_vm9, %v909_v47, %v749_v27  ;;  %v2639_v47 = vld [vmem:[#allocation3] sm:$0xff] }
 0x1a1   : > { %v855_v56 = vpop.permute.xlu0 %854  ;;  %v777_v15 = vpop.permute.xlu1 %776 }
 0x1a2   : > { %v953_v60 = vsel %vm946_vm13, %v944_v59, %v855_v56  ;;  %v927_v62 = vsel %vm919_vm10, %v918_v29, %v777_v15  ;;  %v1147_v29 = vld [vmem:[#allocation3 + $0x8] sm:$0x3] }
 0x1a5   : > { %v882_v61 = vpop.permute.xlu0 %881  ;;  %v804_v41 = vpop.permute.xlu1 %803 }
 0x1a6   : > { %v962_v17 = vsel %vm955_vm14, %v953_v60, %v882_v61  ;;  %v936_v63 = vsel %vm928_vm11, %v927_v62, %v804_v41  ;;  %v1182_v62 = vrot.slane %v2639_v47, 1 }
 0x1a7   : > { %1795 = vmatprep.mubr.msk.f32.mxu0 %vm969_vm15, %v962_v17 }
 0x1a9   : > { %v829_v58 = vpop.permute.xlu1 %828 }
 0x1aa   : > { %v945_v0 = vsel %vm937_vm12, %v936_v63, %v829_v58  ;;  %v1183_v63 = vrot.slane %v1147_v29, 1 }
 0x1ad   : > { %v857_v30 = vpop.permute.xlu1 %856 }
 0x1ae   : > { %v954_v1 = vsel %vm946_vm13, %v945_v0, %v857_v30  ;;  %v1490_v30 = vld [vmem:[%s2965_s5 + $0x78] sm:$0xff]  ;;  %v2019_v0 = vmov 0.0  }
 0x1af   : > { %1798 = vmatprep.subr.mxu1 %v2019_v0  ;;  %1509 = vmatprep.subr.mxu0 %v2019_v0 }
 0x1b0   : > { %1816 = vmatpush1.msra.mxu1 %v1490_v30  ;;  %1510 = vmatpush1.msra.mxu0 %v1490_v30 }
 0x1b1   : > { %v884_v2 = vpop.permute.xlu1 %883  ;;  %1799 = vmatprep.subr.mxu1 %v2019_v0  ;;  %1511 = vmatprep.subr.mxu0 %v2019_v0 }
 0x1b2   : > { %v963_v19 = vsel %vm955_vm14, %v954_v1, %v884_v2  ;;  %v1489_v1 = vld [vmem:[%s2965_s5 + $0x70] sm:$0xff] }
 0x1b3   : > { %1796 = vmatmul.mubr.msk.f32.gmra.mxu0 %vm969_vm15, %v963_v19  ;;  %1817 = vmatpush1.msra.mxu1 %v1489_v1 }
 0x1b4   : > { %1512 = vmatpush1.msra.mxu0 %v1489_v1  ;;  %1800 = vmatprep.subr.mxu1 %v2019_v0 }
 0x1b5   : > { %1513 = vmatprep.subr.mxu0 %v2019_v0 }
 0x224   : > { %v1788_v33 = vpop.f32.mrf.mxu0 }
 0x225   : > { %v1109_v50 = vmul.f32 %v1788_v33, %v2566_v45  ;;  %v1184_v33 = vsel %vm635_vm4, %v1182_v62, %v1183_v63 }
 0x226   : > { %v1064_v4 = vpop.f32.mrf.mxu0 }
 0x227   : > { %v1122_v5 = vadd.f32 %v2571_v34, %v1109_v50  ;;  %v1108_v20 = vmul.f32 %v2566_v45, %v1064_v4 }
 0x229   : > { %v1130_v49 = vmax.f32 %v1122_v5, 0.0  ;;  %v1121_v6 = vadd.f32 %v2571_v34, %v1108_v20  ;;  %v1488_v20 = vld [vmem:[%s2965_s5 + $0x68] sm:$0xff] }
 0x22a   : > { %1818 = vmatpush1.msra.mxu1 %v1488_v20  ;;  %1514 = vmatpush1.msra.mxu0 %v1488_v20 }
 0x22b   : > { %1139 = vst.msk [vmem:[#allocation3 + $0x21] sm:$0xff] %vm919_vm10, %v1130_v49  ;;  %v1129_v32 = vmax.f32 %v1121_v6, 0.0  ;;  %1801 = vmatprep.subr.mxu1 %v2019_v0  ;;  %1515 = vmatprep.subr.mxu0 %v2019_v0 }
 0x22d   : > { %1138 = vst.msk [vmem:[#allocation3 + $0x11] sm:$0xff] %vm919_vm10, %v1129_v32  ;;  %v1230_v32 = vrot.slane %v2639_v47, 2 }
 0x232   : > { %v2579_v35 = vld [vmem:[#allocation3 + $0x20] sm:$0xff]  ;;  %v1151_v21 = vld [vmem:[#allocation3 + $0x28] sm:$0x3] }
 0x233   : > { %v1236_v36 = vrot.slane %v2579_v35, 2  ;;  %v1237_v22 = vrot.slane %v1151_v21, 2  ;;  %v1189_v46 = vrot.slane %v1151_v21, 1  ;;  %v1188_v26 = vrot.slane %v2579_v35, 1  ;;  %v1487_v21 = vld [vmem:[%s2965_s5 + $0x60] sm:$0xff] }
 0x234   : > { %v1791_v37 = vpop.f32.mrf.mxu0  ;;  %1819 = vmatpush1.msra.mxu1 %v1487_v21  ;;  %1516 = vmatpush1.msra.mxu0 %v1487_v21 }
 0x235   : > { %v1111_v7 = vmul.f32 %v1791_v37, %v2566_v45  ;;  %v2584_v8 = vsel %vm684_vm5, %v1236_v36, %v1237_v22  ;;  %v2616_v55 = vsel %vm635_vm4, %v1188_v26, %v1189_v46  ;;  %v1231_v22 = vrot.slane %v1147_v29, 2  ;;  %1802 = vmatprep.subr.mxu1 %v2019_v0  ;;  %1517 = vmatprep.subr.mxu0 %v2019_v0  ;;  %v1481_v46 = vld [vmem:[%s2965_s5 + $0x30] sm:$0xff]  ;;  %v1479_v26 = vld [vmem:[%s2965_s5 + $0x20] sm:$0xff] }
 0x236   : > { %v1074_v39 = vpop.f32.mrf.mxu0  ;;  %1748 = vmatprep.mubr.msk.f32.mxu0 %vm919_vm10, %v2584_v8 }
 0x237   : > { %v1124_v40 = vadd.f32 %v2571_v34, %v1111_v7  ;;  %v1110_v3 = vmul.f32 %v2566_v45, %v1074_v39  ;;  %v1486_v39 = vld [vmem:[%s2965_s5 + $0x58] sm:$0xff] }
 0x238   : > { %1820 = vmatpush1.msra.mxu1 %v1486_v39  ;;  %1518 = vmatpush1.msra.mxu0 %v1486_v39 }
 0x239   : > { %v1132_v9 = vmax.f32 %v1124_v40, 0.0  ;;  %v1123_v23 = vadd.f32 %v2571_v34, %v1110_v3  ;;  %v1485_v40 = vld [vmem:[%s2965_s5 + $0x50] sm:$0xff]  ;;  %1803 = vmatprep.subr.mxu1 %v2019_v0  ;;  %1519 = vmatprep.subr.mxu0 %v2019_v0 }
 0x23a   : > { %1821 = vmatpush1.msra.mxu1 %v1485_v40  ;;  %1520 = vmatpush1.msra.mxu0 %v1485_v40 }
 0x23b   : > { %1141 = vst.msk [vmem:[#allocation3 + $0x41] sm:$0xff] %vm919_vm10, %v1132_v9  ;;  %v1131_v24 = vmax.f32 %v1123_v23, 0.0  ;;  %v1232_v9 = vsel %vm684_vm5, %v1230_v32, %v1231_v22  ;;  %1804 = vmatprep.subr.mxu1 %v2019_v0  ;;  %1521 = vmatprep.subr.mxu0 %v2019_v0  ;;  %v1149_v22 = vld [vmem:[#allocation3 + $0x18] sm:$0x3] }
 0x23d   : > { %1140 = vst.msk [vmem:[#allocation3 + $0x31] sm:$0xff] %vm919_vm10, %v1131_v24  ;;  %v1484_v24 = vld [vmem:[%s2965_s5 + $0x48] sm:$0xff] }
 0x23e   : > { %1822 = vmatpush1.msra.mxu1 %v1484_v24  ;;  %1522 = vmatpush1.msra.mxu0 %v1484_v24 }
 0x23f   : > { %1805 = vmatprep.subr.mxu1 %v2019_v0  ;;  %1523 = vmatprep.subr.mxu0 %v2019_v0 }
 0x242   : > { %v2593_v42 = vld [vmem:[#allocation3 + $0x40] sm:$0xff]  ;;  %v1155_v43 = vld [vmem:[#allocation3 + $0x48] sm:$0x3] }
 0x243   : > { %v1242_v44 = vrot.slane %v2593_v42, 2  ;;  %v1243_v38 = vrot.slane %v1155_v43, 2  ;;  %v1195_v53 = vrot.slane %v1155_v43, 1  ;;  %v1194_v14 = vrot.slane %v2593_v42, 1  ;;  %v1483_v43 = vld [vmem:[%s2965_s5 + $0x40] sm:$0xff] }
 0x244   : > { %v2596_v31 = vld [vmem:[#allocation3 + $0x30] sm:$0xff]  ;;  %v1153_v25 = vld [vmem:[#allocation3 + $0x38] sm:$0x3]  ;;  %1823 = vmatpush1.msra.mxu1 %v1483_v43  ;;  %1524 = vmatpush1.msra.mxu0 %v1483_v43  ;;  %v1234_v43 = vrot.slane %v1149_v22, 2 }
 0x245   : > { %v1192_v11 = vrot.slane %v1153_v25, 1  ;;  %v1239_v12 = vrot.slane %v2596_v31, 2  ;;  %v1240_v10 = vrot.slane %v1153_v25, 2  ;;  %v2601_v48 = vsel %vm684_vm5, %v1242_v44, %v1243_v38  ;;  %v1482_v38 = vld [vmem:[%s2965_s5 + $0x38] sm:$0xff]  ;;  %1806 = vmatprep.subr.mxu1 %v2019_v0  ;;  %v1480_v25 = vld [vmem:[%s2965_s5 + $0x28] sm:$0xff]  ;;  %1525 = vmatprep.subr.mxu0 %v2019_v0 }
 0x246   : > { %1750 = vmatprep.mubr.msk.f32.mxu1 %vm919_vm10, %v2601_v48  ;;  %v1858_v51 = vpack.i.bf16 %v2593_v42, %v2596_v31  ;;  %v1191_v52 = vrot.slane %v2596_v31, 1  ;;  %v2625_v56 = vsel %vm635_vm4, %v1194_v14, %v1195_v53  ;;  %1824 = vmatpush1.msra.mxu1 %v1482_v38 }
 0x247   : > { %v2609_v13 = vsel %vm684_vm5, %v1239_v12, %v1240_v10  ;;  %1807 = vmatprep.subr.mxu1 %v2019_v0  ;;  %1526 = vmatpush1.msra.mxu0 %v1482_v38 }
 0x248   : > { %1859 = vrot.lane.b32.xlu0 %v1858_v51, %s2016_s21  ;;  %v1868_v54 = vpack.i.bf16 %v2609_v13, %v2584_v8  ;;  %v2619_v27 = vsel %vm635_vm4, %v1191_v52, %v1192_v11  ;;  %v1878_v16 = vpack.i.bf16 %v2601_v48, %v2609_v13  ;;  %1825 = vmatpush1.msra.mxu1 %v1481_v46  ;;  %v1478_v11 = vld [vmem:[%s2965_s5 + $0x18] sm:$0xff]  ;;  %v1477_v51 = vld [vmem:[%s2965_s5 + $0x10] sm:$0xff] }
 0x249   : > { %v1863_v28 = vpack.i.bf16 %v2619_v27, %v2616_v55  ;;  %v1873_v15 = vpack.i.bf16 %v2625_v56, %v2619_v27  ;;  %1808 = vmatprep.subr.mxu1 %v2019_v0  ;;  %1527 = vmatprep.subr.mxu0 %v2019_v0 }
 0x24a   : > { %1869 = vrot.lane.b32.xlu1 %v1868_v54, %s2015_s18  ;;  %1826 = vmatpush1.msra.mxu1 %v1480_v25  ;;  %v1476_v54 = vld [vmem:[%s2965_s5 + $0x8] sm:$0xff] }
 0x24b   : > { %1809 = vmatprep.subr.mxu1 %v2019_v0  ;;  %1528 = vmatpush1.msra.mxu0 %v1481_v46 }
 0x24c   : > { %1864 = vrot.lane.b32.xlu0 %v1863_v28, %s2012_s25  ;;  %1827 = vmatpush1.msra.mxu1 %v1479_v26 }
 0x24d   : > { %1810 = vmatprep.subr.mxu1 %v2019_v0  ;;  %1529 = vmatprep.subr.mxu0 %v2019_v0 }
 0x24e   : > { %1874 = vrot.lane.b32.xlu1 %v1873_v15, %s2017_s22  ;;  %1828 = vmatpush1.msra.mxu1 %v1478_v11 }
 0x24f   : > { %1811 = vmatprep.subr.mxu1 %v2019_v0  ;;  %1530 = vmatpush1.msra.mxu0 %v1480_v25 }
 0x250   : > { %1879 = vrot.lane.b32.xlu0 %v1878_v16, %s2018_s23  ;;  %v1794_v57 = vpop.f32.mrf.mxu0  ;;  %1829 = vmatpush1.msra.mxu1 %v1477_v51  ;;  %v1475_v16 = vld [vmem:[%s2965_s5] sm:$0xff] }
 0x251   : > { %v1113_v59 = vmul.f32 %v1794_v57, %v2566_v45  ;;  %1812 = vmatprep.subr.mxu1 %v2019_v0  ;;  %1531 = vmatprep.subr.mxu0 %v2019_v0  ;;  %v1492_v57 = vld [vmem:[%s2965_s5 + $0x88] sm:$0xff] }
 0x252   : > { %v1084_v60 = vpop.f32.mrf.mxu0  ;;  %1830 = vmatpush1.msra.mxu1 %v1476_v54  ;;  %1532 = vmatpush1.msra.mxu0 %v1479_v26  ;;  %v2809_v26 = vld [vmem:[#allocation3 + $0x90] sm:$0xff] }
 0x253   : > { %v1126_v61 = vadd.f32 %v2571_v34, %v1113_v59  ;;  %v1112_v41 = vmul.f32 %v2566_v45, %v1084_v60  ;;  %1813 = vmatprep.subr.mxu1 %v2019_v0  ;;  %1533 = vmatprep.subr.mxu0 %v2019_v0  ;;  %v1491_v59 = vld [vmem:[%s2965_s5 + $0x80] sm:$0xff] }
 0x254   : > { %1831 = vmatpush1.msra.mxu1 %v1475_v16  ;;  %1534 = vmatpush1.msra.mxu0 %v1478_v11  ;;  %v2811_v11 = vld [vmem:[#allocation3 + $0x98] sm:$0x3] }
 0x255   : > { %v1134_v17 = vmax.f32 %v1126_v61, 0.0  ;;  %v1125_v58 = vadd.f32 %v2571_v34, %v1112_v41  ;;  %1814 = vmatprep.subr.mxu1 %v2019_v0  ;;  %1535 = vmatprep.subr.mxu0 %v2019_v0 }
 0x256   : > { %1832 = vmatpush2.msra.mxu1 %v1492_v57  ;;  %1536 = vmatpush1.msra.mxu0 %v1477_v51 }
 0x257   : > { %1143 = vst.msk [vmem:[#allocation3 + $0x61] sm:$0xff] %vm919_vm10, %v1134_v17  ;;  %v1133_v18 = vmax.f32 %v1125_v58, 0.0  ;;  %1815 = vmatprep.subr.mxu1 %v2019_v0  ;;  %1537 = vmatprep.subr.mxu0 %v2019_v0 }
 0x258   : > { %1833 = vmatpush2.msra.mxu1 %v1491_v59  ;;  %1538 = vmatpush1.msra.mxu0 %v1476_v54 }
 0x259   : > { %1142 = vst.msk [vmem:[#allocation3 + $0x51] sm:$0xff] %vm919_vm10, %v1133_v18  ;;  %1539 = vmatprep.subr.mxu0 %v2019_v0 }
 0x25a   : > { %1540 = vmatpush1.msra.mxu0 %v1475_v16 }
 0x25b   : > { %1569 = vmatprep.subr.mxu0 %v2019_v0 }
 0x25c   : > { %1570 = vmatpush2.msra.mxu0 %v1492_v57 }
 0x25d   : > { %1571 = vmatprep.subr.mxu0 %v2019_v0 }
 0x25e   : > { %v2653_v2 = vld [vmem:[#allocation3 + $0x60] sm:$0xff]  ;;  %v1159_v19 = vld [vmem:[#allocation3 + $0x68] sm:$0x3]  ;;  %1572 = vmatpush2.msra.mxu0 %v1491_v59 }
 0x25f   : > { %v1200_v50 = vrot.slane %v2653_v2, 1  ;;  %v1201_v4 = vrot.slane %v1159_v19, 1  ;;  %v1248_v37 = vrot.slane %v2653_v2, 2  ;;  %v1249_v7 = vrot.slane %v1159_v19, 2 }
 0x260   : > { %v2659_v5 = vld [vmem:[#allocation3 + $0x50] sm:$0xff] }
 0x261   : > { %v1883_v49 = vpack.i.bf16 %v2659_v5, %v2593_v42  ;;  %v2667_v6 = vsel %vm635_vm4, %v1200_v50, %v1201_v4  ;;  %v1888_v3 = vpack.i.bf16 %v2653_v2, %v2659_v5  ;;  %v2689_v23 = vsel %vm684_vm5, %v1248_v37, %v1249_v7 }
 0x262   : > { %v1893_v36 = vpack.i.bf16 %v2667_v6, %v1184_v33  ;;  %v1898_v44 = vpack.i.bf16 %v2689_v23, %v1232_v9  ;;  %v1197_v60 = vrot.slane %v2659_v5, 1  ;;  %v1245_v18 = vrot.slane %v2659_v5, 2 }
 0x263   : > { %1884 = vrot.lane.b32.xlu1 %v1883_v49, %s2020_s13  ;;  %v1186_v7 = vrot.slane %v1149_v22, 1 }
 0x264   : > { %1894 = vrot.lane.b32.xlu0 %v1893_v36, %s2012_s25  ;;  %v2788_v36 = vld [vmem:[#allocation3 + $0x10] sm:$0xff] }
 0x265   : > { %v1185_v37 = vrot.slane %v2788_v36, 1  ;;  %v1233_v24 = vrot.slane %v2788_v36, 2 }
 0x267   : > { %1889 = vrot.lane.b32.xlu1 %v1888_v3, %s2016_s21  ;;  %v1187_v9 = vsel %vm635_vm4, %v1185_v37, %v1186_v7 }
 0x26b   : > { %1899 = vrot.lane.b32.xlu1 %v1898_v44, %s2015_s18 }
 0x273   : > { %v1797_v12 = vpop.f32.mrf.mxu0 }
 0x274   : > { %v1115_v10 = vmul.f32 %v1797_v12, %v2566_v45  ;;  %v1235_v12 = vsel %vm684_vm5, %v1233_v24, %v1234_v43 }
 0x275   : > { %v1094_v52 = vpop.f32.mrf.mxu0 }
 0x276   : > { %v1128_v53 = vadd.f32 %v2571_v34, %v1115_v10  ;;  %v1114_v14 = vmul.f32 %v2566_v45, %v1094_v52  ;;  %v1384_v52 = vrot.slane %v2809_v26, 1 }
 0x278   : > { %v1136_v28 = vmax.f32 %v1128_v53, 0.0  ;;  %v1127_v15 = vadd.f32 %v2571_v34, %v1114_v14  ;;  %v1157_v34 = vld [vmem:[#allocation3 + $0x58] sm:$0x3]  ;;  %v1385_v53 = vrot.slane %v2811_v11, 1 }
 0x279   : > { %v1198_v61 = vrot.slane %v1157_v34, 1  ;;  %v1246_v29 = vrot.slane %v1157_v34, 2 }
 0x27a   : > { %1145 = vst.msk [vmem:[#allocation3 + $0x81] sm:$0xff] %vm919_vm10, %v1136_v28  ;;  %v1135_v45 = vmax.f32 %v1127_v15, 0.0  ;;  %v1386_v54 = vsel %vm635_vm4, %v1384_v52, %v1385_v53  ;;  %v1988_v15 = vpack.i.bf16 %v2809_v26, %v2596_v31 }
 0x27b   : > { %v1199_v58 = vsel %vm635_vm4, %v1197_v60, %v1198_v61  ;;  %v2772_v63 = vsel %vm684_vm5, %v1245_v18, %v1246_v29  ;;  %v1993_v28 = vpack.i.bf16 %v1386_v54, %v2619_v27 }
 0x27c   : > { %1144 = vst.msk [vmem:[#allocation3 + $0x71] sm:$0xff] %vm919_vm10, %v1135_v45  ;;  %v1913_v62 = vpack.i.bf16 %v1199_v58, %v2625_v56  ;;  %v1923_v4 = vpack.i.bf16 %v2772_v63, %v2601_v48  ;;  %v1933_v56 = vpack.i.bf16 %v2689_v23, %v2772_v63  ;;  %v1928_v32 = vpack.i.bf16 %v2667_v6, %v1199_v58 }
 0x281   : > { %v1162_v41 = vld [vmem:[#allocation3 + $0x80] sm:$0xff]  ;;  %v1163_v30 = vld [vmem:[#allocation3 + $0x88] sm:$0x3] }
 0x282   : > { %v1908_v17 = vpack.i.bf16 %v1162_v41, %v2579_v35  ;;  %v1304_v1 = vrot.slane %v1162_v41, 1  ;;  %v1305_v19 = vrot.slane %v1163_v30, 1  ;;  %v1332_v25 = vrot.slane %v1163_v30, 2 }
 0x283   : > { %v2776_v33 = vld [vmem:[#allocation3 + $0x70] sm:$0xff]  ;;  %v1161_v50 = vld [vmem:[#allocation3 + $0x78] sm:$0x3] }
 0x284   : > { %1909 = vrot.lane.b32.xlu0 %v1908_v17, %s2016_s21  ;;  %1904 = vrot.lane.b32.xlu1 %v1908_v17, %s2020_s13  ;;  %v1306_v0 = vsel %vm635_vm4, %v1304_v1, %v1305_v19  ;;  %v1203_v20 = vrot.slane %v2776_v33, 1  ;;  %v1204_v49 = vrot.slane %v1161_v50, 1  ;;  %v1938_v39 = vpack.i.bf16 %v2776_v33, %v2653_v2 }
 0x285   : > { %v1948_v21 = vpack.i.bf16 %v1306_v0, %v2616_v55  ;;  %v1251_v3 = vrot.slane %v2776_v33, 2  ;;  %v1252_v55 = vrot.slane %v1161_v50, 2  ;;  %v1943_v44 = vpack.i.bf16 %v2776_v33, %v2788_v36 }
 0x286   : > { %v1205_v48 = vsel %vm635_vm4, %v1203_v20, %v1204_v49  ;;  %vm1466_vm4 = vcmask 916480  }
 0x287   : > { %v1958_v40 = vpack.i.bf16 %v1205_v48, %v2667_v6  ;;  %v1963_v38 = vpack.i.bf16 %v1205_v48, %v1187_v9  ;;  %v2805_v46 = vsel %vm684_vm5, %v1251_v3, %v1252_v55  ;;  %v1331_v6 = vrot.slane %v1162_v41, 2 }
 0x288   : > { %1914 = vrot.lane.b32.xlu0 %v1913_v62, %s2021_s9  ;;  %1919 = vrot.lane.b32.xlu1 %v1913_v62, %s2012_s25  ;;  %v1973_v10 = vpack.i.bf16 %v2805_v46, %v1235_v12 }
 0x289   : > { %v2816_v51 = vsel %vm684_vm5, %v1331_v6, %v1332_v25 }
 0x28a   : > { %v1978_v14 = vpack.i.bf16 %v2816_v51, %v2584_v8 }
 0x28c   : > { %1924 = vrot.lane.b32.xlu0 %v1923_v4, %s2015_s18  ;;  %1934 = vrot.lane.b32.xlu1 %v1933_v56, %s2018_s23 }
 0x290   : > { %1929 = vrot.lane.b32.xlu0 %v1928_v32, %s2017_s22  ;;  %1949 = vrot.lane.b32.xlu1 %v1948_v21, %s2021_s9 }
 0x294   : > { %1939 = vrot.lane.b32.xlu0 %v1938_v39, %s2020_s13  ;;  %1959 = vrot.lane.b32.xlu1 %v1958_v40, %s2021_s9 }
 0x298   : > { %1944 = vrot.lane.b32.xlu0 %v1943_v44, %s2016_s21  ;;  %1964 = vrot.lane.b32.xlu1 %v1963_v38, %s2017_s22 }
 0x29c   : > { %1954 = vrot.lane.b32.xlu0 %v1948_v21, %s2017_s22  ;;  %1974 = vrot.lane.b32.xlu1 %v1973_v10, %s2018_s23 }
 0x2a0   : > { %1969 = vrot.lane.b32.xlu0 %v1963_v38, %s2012_s25  ;;  %1979 = vrot.lane.b32.xlu1 %v1978_v14, %s2018_s23 }
 0x2a4   : > { %1984 = vrot.lane.b32.xlu0 %v1973_v10, %s2015_s18  ;;  %1994 = vrot.lane.b32.xlu1 %v1993_v28, %s2021_s9 }
 0x2a8   : > { %1989 = vrot.lane.b32.xlu0 %v1988_v15, %s2020_s13 }
 0x2ba   : > { %v1860_v45 = vpop.permute.xlu0 %1859 }
 0x2bb   : > { %v1861_v30 = vunpack.i.l.bf16 %v1860_v45  ;;  %v1862_v0 = vunpack.i.h.bf16 %v1860_v45 }
 0x2bc   : > { %v1870_v16 = vpop.permute.xlu1 %1869 }
 0x2bd   : > { %v1871_v17 = vunpack.i.l.bf16 %v1870_v16  ;;  %v1872_v1 = vunpack.i.h.bf16 %v1870_v16 }
 0x2be   : > { %v1865_v57 = vpop.permute.xlu0 %1864 }
 0x2bf   : > { %v1866_v59 = vunpack.i.l.bf16 %v1865_v57  ;;  %v1867_v41 = vunpack.i.h.bf16 %v1865_v57 }
 0x2c0   : > { %v1875_v8 = vpop.permute.xlu1 %1874 }
 0x2c1   : > { %v1416_v27 = vsel %vm919_vm10, %v2579_v35, %v1866_v59  ;;  %v1417_v62 = vsel %vm919_vm10, %v2596_v31, %v1867_v41  ;;  %v1876_v19 = vunpack.i.l.bf16 %v1875_v8  ;;  %v1877_v49 = vunpack.i.h.bf16 %v1875_v8 }
 0x2c2   : > { %v1880_v61 = vpop.permute.xlu0 %1879  ;;  %v1424_v58 = vsel %vm955_vm14, %v1416_v27, %v1871_v17  ;;  %v1425_v4 = vsel %vm955_vm14, %v1417_v62, %v1872_v1 }
 0x2c3   : > { %v1433_v50 = vsel %vm1430_vm0, %v1424_v58, %v1861_v30  ;;  %v1881_v20 = vunpack.i.l.bf16 %v1880_v61  ;;  %v1434_v31 = vsel %vm1430_vm0, %v1425_v4, %v1862_v0  ;;  %v1882_v37 = vunpack.i.h.bf16 %v1880_v61 }
 0x2c4   : > { %v1442_v32 = vsel %vm1439_vm1, %v1433_v50, %v1876_v19  ;;  %v1443_v40 = vsel %vm1439_vm1, %v1434_v31, %v1877_v49 }
 0x2c5   : > { %v1451_v39 = vsel %vm1448_vm2, %v1442_v32, %v1881_v20  ;;  %v1452_v10 = vsel %vm1448_vm2, %v1443_v40, %v1882_v37 }
 0x2d5   : > { %v1885_v34 = vpop.permute.xlu1 %1884 }
 0x2d6   : > { %v2838_v18 = vpop.permute.xlu0 %1894  ;;  %v1886_v21 = vunpack.i.l.bf16 %v1885_v34  ;;  %v1887_v3 = vunpack.i.h.bf16 %v1885_v34 }
 0x2d7   : > { %v1897_v61 = vunpack.i.h.bf16 %v2838_v18 }
 0x2d8   : > { %v1460_v9 = vsel %vm1457_vm3, %v1451_v39, %v1886_v21  ;;  %v1461_v53 = vsel %vm1457_vm3, %v1452_v10, %v1887_v3 }
 0x2d9   : > { %v2833_v60 = vpop.permute.xlu1 %1889 }
 0x2da   : > { %v1891_v28 = vunpack.i.l.bf16 %v2833_v60 }
 0x2dd   : > { %v2840_v29 = vpop.permute.xlu1 %1899 }
 0x2de   : > { %v1901_v19 = vunpack.i.l.bf16 %v2840_v29 }
 0x2f6   : > { %v2846_v35 = vpop.permute.xlu0 %1909  ;;  %v2848_v56 = vpop.permute.xlu1 %1904 }
 0x2fa   : > { %v1915_v22 = vpop.permute.xlu0 %1914  ;;  %v1920_v48 = vpop.permute.xlu1 %1919 }
 0x2fb   : > { %v1916_v7 = vunpack.i.l.bf16 %v1915_v22  ;;  %v1921_v55 = vunpack.i.l.bf16 %v1920_v48  ;;  %v1917_v24 = vunpack.i.h.bf16 %v1915_v22  ;;  %v1922_v44 = vunpack.i.h.bf16 %v1920_v48 }
 0x2fd   : > { %v1469_v43 = vsel %vm1466_vm4, %v1460_v9, %v1916_v7  ;;  %v1418_v52 = vsel %vm919_vm10, %v2593_v42, %v1921_v55  ;;  %v1470_v54 = vsel %vm1466_vm4, %v1461_v53, %v1917_v24  ;;  %v1419_v15 = vsel %vm919_vm10, %v2659_v5, %v1922_v44 }
 0x2fe   : > { %v1925_v38 = vpop.permute.xlu0 %1924  ;;  %v1935_v6 = vpop.permute.xlu1 %1934  ;;  %1584 = vmatmul.mubr.f32.vlgmr.msra.gmra.mxu1 %v1469_v43  ;;  %v1892_v42 = vunpack.i.h.bf16 %v2833_v60  ;;  %v1896_v5 = vunpack.i.l.bf16 %v2838_v18  ;;  %v1902_v60 = vunpack.i.h.bf16 %v2840_v29  ;;  %v1420_v18 = vsel %vm919_vm10, %v2653_v2, %v1897_v61 }
 0x2ff   : > { %v1927_v25 = vunpack.i.h.bf16 %v1925_v38  ;;  %v1926_v12 = vunpack.i.l.bf16 %v1925_v38  ;;  %1751 = vmatprep.mubr.msk.f32.mxu1 %vm919_vm10, %v2772_v63  ;;  %v1936_v41 = vunpack.i.l.bf16 %v1935_v6  ;;  %v1937_v50 = vunpack.i.h.bf16 %v1935_v6 }
 0x300   : > { %v1414_v22 = vsel %vm919_vm10, %v2639_v47, %v1896_v5  ;;  %v1428_v7 = vsel %vm955_vm14, %v1420_v18, %v1902_v60  ;;  %v1411_v38 = vrot.slane %v2809_v26, 2  ;;  %v1412_v6 = vrot.slane %v2811_v11, 2 }
 0x301   : > { %v1426_v14 = vsel %vm955_vm14, %v1418_v52, %v1926_v12  ;;  %v1427_v63 = vsel %vm955_vm14, %v1419_v15, %v1927_v25  ;;  %v1422_v39 = vsel %vm955_vm14, %v1414_v22, %v1901_v19  ;;  %v1907_v25 = vunpack.i.h.bf16 %v2848_v56 }
 0x302   : > { %v1930_v16 = vpop.permute.xlu0 %1929  ;;  %v2867_v45 = vpop.permute.xlu1 %1949  ;;  %1589 = vmatmul.mubr.f32.gmra.mxu1 %v1470_v54  ;;  %v1435_v57 = vsel %vm1430_vm0, %v1426_v14, %v1891_v28  ;;  %v1436_v27 = vsel %vm1430_vm0, %v1427_v63, %v1892_v42  ;;  %v1906_v12 = vunpack.i.l.bf16 %v2848_v56  ;;  %v1413_v15 = vsel %vm684_vm5, %v1411_v38, %v1412_v6 }
 0x303   : > { %v1932_v8 = vunpack.i.h.bf16 %v1930_v16  ;;  %v1931_v34 = vunpack.i.l.bf16 %v1930_v16  ;;  %1752 = vmatprep.mubr.msk.f32.mxu1 %vm919_vm10, %v2689_v23  ;;  %v1952_v14 = vunpack.i.h.bf16 %v2867_v45  ;;  %v1951_v26 = vunpack.i.l.bf16 %v2867_v45 }
 0x305   : > { %v1444_v59 = vsel %vm1439_vm1, %v1435_v57, %v1931_v34  ;;  %v1445_v30 = vsel %vm1439_vm1, %v1436_v27, %v1932_v8  ;;  %v1912_v57 = vunpack.i.h.bf16 %v2846_v35 }
 0x306   : > { %v1940_v17 = vpop.permute.xlu0 %1939  ;;  %v1960_v58 = vpop.permute.xlu1 %1959  ;;  %v1453_v4 = vsel %vm1448_vm2, %v1444_v59, %v1936_v41  ;;  %v1454_v31 = vsel %vm1448_vm2, %v1445_v30, %v1937_v50  ;;  %v1911_v59 = vunpack.i.l.bf16 %v2846_v35 }
 0x307   : > { %v1942_v62 = vunpack.i.h.bf16 %v1940_v17  ;;  %v1941_v1 = vunpack.i.l.bf16 %v1940_v17  ;;  %v1961_v23 = vunpack.i.l.bf16 %v1960_v58  ;;  %v1962_v20 = vunpack.i.h.bf16 %v1960_v58 }
 0x309   : > { %v1462_v0 = vsel %vm1457_vm3, %v1453_v4, %v1941_v1  ;;  %v1463_v37 = vsel %vm1457_vm3, %v1454_v31, %v1942_v62  ;;  %v1756_v31 = vld [vmem:[%s2966_s6] ss:$0 sm:$0xff] }
 0x30a   : > { %v1945_v49 = vpop.permute.xlu0 %1944  ;;  %v1965_v32 = vpop.permute.xlu1 %1964  ;;  %v1471_v21 = vsel %vm1466_vm4, %v1462_v0, %v1961_v23  ;;  %v1472_v24 = vsel %vm1466_vm4, %v1463_v37, %v1962_v20 }
 0x30b   : > { %v1947_v48 = vunpack.i.h.bf16 %v1945_v49  ;;  %v1946_v29 = vunpack.i.l.bf16 %v1945_v49  ;;  %1594 = vmatmul.mubr.f32.gmra.mxu1 %v1471_v21  ;;  %v1967_v2 = vunpack.i.h.bf16 %v1965_v32  ;;  %v1966_v40 = vunpack.i.l.bf16 %v1965_v32 }
 0x30c   : > { %1753 = vmatprep.mubr.msk.f32.mxu1 %vm919_vm10, %v2805_v46 }
 0x30d   : > { %v1431_v3 = vsel %vm1430_vm0, %v1422_v39, %v1946_v29  ;;  %v1437_v55 = vsel %vm1430_vm0, %v1428_v7, %v1947_v48  ;;  %v1757_v48 = vld [vmem:[%s2966_s6 + $0x1] ss:$0 sm:$0xff] }
 0x30e   : > { %v1955_v9 = vpop.permute.xlu0 %1954  ;;  %v1975_v47 = vpop.permute.xlu1 %1974  ;;  %v1440_v46 = vsel %vm1439_vm1, %v1431_v3, %v1966_v40  ;;  %v1446_v10 = vsel %vm1439_vm1, %v1437_v55, %v1967_v2 }
 0x30f   : > { %v1977_v43 = vunpack.i.h.bf16 %v1975_v47  ;;  %v1976_v44 = vunpack.i.l.bf16 %v1975_v47  ;;  %1599 = vmatmul.mubr.f32.gmra.mxu1 %v1472_v24  ;;  %v1957_v41 = vunpack.i.h.bf16 %v1955_v9  ;;  %v1956_v27 = vunpack.i.l.bf16 %v1955_v9 }
 0x310   : > { %1754 = vmatprep.mubr.msk.f32.mxu1 %vm919_vm10, %v2816_v51 }
 0x311   : > { %v1449_v52 = vsel %vm1448_vm2, %v1440_v46, %v1976_v44  ;;  %v1455_v53 = vsel %vm1448_vm2, %v1446_v10, %v1977_v43 }
 0x312   : > { %v1970_v11 = vpop.permute.xlu0 %1969  ;;  %v1458_v54 = vsel %vm1457_vm3, %v1449_v52, %v1906_v12  ;;  %v1464_v56 = vsel %vm1457_vm3, %v1455_v53, %v1907_v25  ;;  %v1980_v28 = vpop.permute.xlu1 %1979 }
 0x313   : > { %v1972_v16 = vunpack.i.h.bf16 %v1970_v11  ;;  %v1971_v63 = vunpack.i.l.bf16 %v1970_v11  ;;  %v1467_v51 = vsel %vm1466_vm4, %v1458_v54, %v1951_v26  ;;  %v1473_v8 = vsel %vm1466_vm4, %v1464_v56, %v1952_v14 }
 0x314   : > { %1574 = vmatmul.mubr.f32.vlgmr.msra.gmra.mxu0 %v1467_v51  ;;  %1604 = vmatmul.mubr.f32.gmra.mxu1 %v1473_v8  ;;  %v1982_v30 = vunpack.i.h.bf16 %v1980_v28  ;;  %v1981_v62 = vunpack.i.l.bf16 %v1980_v28 }
 0x315   : > { %1749 = vmatprep.mubr.msk.f32.mxu0 %vm919_vm10, %v2609_v13  ;;  %1755 = vmatprep.mubr.msk.f32.mxu1 %vm919_vm10, %v1413_v15  ;;  %v1421_v61 = vsel %vm919_vm10, %v2776_v33, %v1972_v16  ;;  %v1415_v5 = vsel %vm919_vm10, %v2788_v36, %v1971_v63 }
 0x316   : > { %v1985_v45 = vpop.permute.xlu0 %1984  ;;  %v1995_v58 = vpop.permute.xlu1 %1994 }
 0x317   : > { %v1987_v34 = vunpack.i.h.bf16 %v1985_v45  ;;  %v1986_v42 = vunpack.i.l.bf16 %v1985_v45  ;;  %v1997_v50 = vunpack.i.h.bf16 %v1995_v58  ;;  %v1996_v4 = vunpack.i.l.bf16 %v1995_v58 }
 0x319   : > { %v1423_v17 = vsel %vm955_vm14, %v1415_v5, %v1986_v42  ;;  %v1429_v13 = vsel %vm955_vm14, %v1421_v61, %v1987_v34 }
 0x31a   : > { %v1432_v1 = vsel %vm1430_vm0, %v1423_v17, %v1911_v59  ;;  %v1438_v23 = vsel %vm1430_vm0, %v1429_v13, %v1912_v57  ;;  %v1990_v35 = vpop.permute.xlu0 %1989 }
 0x31b   : > { %v1992_v60 = vunpack.i.h.bf16 %v1990_v35  ;;  %v1991_v19 = vunpack.i.l.bf16 %v1990_v35  ;;  %v1441_v33 = vsel %vm1439_vm1, %v1432_v1, %v1956_v27  ;;  %v1447_v36 = vsel %vm1439_vm1, %v1438_v23, %v1957_v41 }
 0x31c   : > { %v1450_v0 = vsel %vm1448_vm2, %v1441_v33, %v1981_v62  ;;  %v1456_v18 = vsel %vm1448_vm2, %v1447_v36, %v1982_v30 }
 0x31d   : > { %v1459_v20 = vsel %vm1457_vm3, %v1450_v0, %v1991_v19  ;;  %v1465_v49 = vsel %vm1457_vm3, %v1456_v18, %v1992_v60 }
 0x31e   : > { %v1468_v32 = vsel %vm1466_vm4, %v1459_v20, %v1996_v4  ;;  %v1474_v21 = vsel %vm1466_vm4, %v1465_v49, %v1997_v50 }
 0x31f   : > { %1579 = vmatmul.mubr.f32.gmra.mxu0 %v1468_v32  ;;  %1609 = vmatmul.mubr.f32.gmra.mxu1 %v1474_v21 }
 0x3be   : > { %v1585_v22 = vpop.f32.mrf.mxu1 }
 0x3bf   : > { %v1621_v29 = vmul.f32 %v1756_v31, %v1585_v22 }
 0x3c0   : > { %v1587_v37 = vpop.f32.mrf.mxu1 }
 0x3c1   : > { %v1634_v7 = vadd.f32 %v1757_v48, %v1621_v29 }
 0x3c2   : > { %v1590_v39 = vpop.f32.mrf.mxu1 }
 0x3c3   : > { %v1642_v2 = vmax.f32 %v1634_v7, 0.0  ;;  %v1622_v40 = vmul.f32 %v1756_v31, %v1590_v39 }
 0x3c4   : > { %v1592_v3 = vpop.f32.mrf.mxu1 }
 0x3c5   : > { %1650 = vst.msk [vmem:[%s2083_s14 + $0x10] sm:$0xff] %vm919_vm10, %v1642_v2  ;;  %v1635_v55 = vadd.f32 %v1757_v48, %v1622_v40 }
 0x3c7   : > { %v1643_v9 = vmax.f32 %v1635_v55, 0.0 }
 0x3c9   : > { %1651 = vst.msk [vmem:[%s2083_s14 + $0x18] sm:$0xff] %vm919_vm10, %v1643_v9 }
 0x3cb   : > { %v1595_v47 = vpop.f32.mrf.mxu1 }
 0x3cc   : > { %v1623_v24 = vmul.f32 %v1756_v31, %v1595_v47 }
 0x3cd   : > { %v1597_v43 = vpop.f32.mrf.mxu1 }
 0x3ce   : > { %v1636_v44 = vadd.f32 %v1757_v48, %v1623_v24 }
 0x3cf   : > { %v1600_v38 = vpop.f32.mrf.mxu1 }
 0x3d0   : > { %v1644_v6 = vmax.f32 %v1636_v44, 0.0  ;;  %v1624_v25 = vmul.f32 %v1756_v31, %v1600_v38 }
 0x3d1   : > { %v1602_v12 = vpop.f32.mrf.mxu1 }
 0x3d2   : > { %1652 = vst.msk [vmem:[%s2083_s14 + $0x20] sm:$0xff] %vm919_vm10, %v1644_v6  ;;  %v1637_v46 = vadd.f32 %v1757_v48, %v1624_v25 }
 0x3d4   : > { %v1645_v10 = vmax.f32 %v1637_v46, 0.0  ;;  %v1575_v52 = vpop.f32.mrf.mxu0  ;;  %v1605_v53 = vpop.f32.mrf.mxu1 }
 0x3d5   : > { %v1619_v14 = vmul.f32 %v1756_v31, %v1575_v52  ;;  %v1625_v26 = vmul.f32 %v1756_v31, %v1605_v53 }
 0x3d6   : > { %1653 = vst.msk [vmem:[%s2083_s14 + $0x28] sm:$0xff] %vm919_vm10, %v1645_v10  ;;  %v1577_v11 = vpop.f32.mrf.mxu0  ;;  %v1607_v54 = vpop.f32.mrf.mxu1 }
 0x3d7   : > { %v1632_v56 = vadd.f32 %v1757_v48, %v1619_v14  ;;  %v1638_v28 = vadd.f32 %v1757_v48, %v1625_v26 }
 0x3d9   : > { %v1640_v15 = vmax.f32 %v1632_v56, 0.0  ;;  %v1646_v16 = vmax.f32 %v1638_v28, 0.0 }
 0x3db   : > { %1648 = vst.msk [vmem:[%s2083_s14] sm:$0xff] %vm919_vm10, %v1640_v15  ;;  %1654 = vst.msk [vmem:[%s2083_s14 + $0x30] sm:$0xff] %vm919_vm10, %v1646_v16 }
 0x3df   : > { %v1580_v63 = vpop.f32.mrf.mxu0  ;;  %v1610_v51 = vpop.f32.mrf.mxu1 }
 0x3e0   : > { %v1620_v8 = vmul.f32 %v1756_v31, %v1580_v63  ;;  %v1626_v45 = vmul.f32 %v1756_v31, %v1610_v51 }
 0x3e1   : > { %v1582_v34 = vpop.f32.mrf.mxu0  ;;  %v1612_v42 = vpop.f32.mrf.mxu1 }
 0x3e2   : > { %v1633_v57 = vadd.f32 %v1757_v48, %v1620_v8  ;;  %v1639_v59 = vadd.f32 %v1757_v48, %v1626_v45 }
 0x3e4   : > { %v1641_v61 = vmax.f32 %v1633_v57, 0.0  ;;  %v1647_v5 = vmax.f32 %v1639_v59, 0.0 }
 0x3e6   : > { %1649 = vst.msk [vmem:[%s2083_s14 + $0x8] sm:$0xff] %vm919_vm10, %v1641_v61  ;;  %1655 = vst.msk [vmem:[%s2083_s14 + $0x38] sm:$0xff] %vm919_vm10, %v1647_v5 }
 0x3e7 PF: > { %s17_s24 = sadd.s32 1, %s2004_s24  }
 0x3e8   : > { %p14_p5 = scmp.ge.s32.totalorder %s17_s24, 4  }
 0x3ea   :  { %16 = sbr.rel (!%p14_p5) target bundleno = 1 (0x1), region = 87 }

</bundles_post_ra>
